<compile_context>
chip_gen: v7x
topology: tpu7x:2x2x1
jax: 0.10.0
libtpu: 0.0.40
codegen_flags: <defaults>
</compile_context>

<pallas_src>
import jax
import jax.numpy as jnp
from jax.experimental import pallas as pl
from jax.experimental.pallas import tpu as pltpu

_LANE = 128      # lane width (last-dim alignment)
_SUBLANE = 8     # sublane width (second-to-last dim alignment)


def _round_up(x, m):
    return ((x + m - 1) // m) * m


# ---------------------------------------------------------------------------
# One-time parameter packing (hoisted out of the per-call path).
# ---------------------------------------------------------------------------
def pack_params(params, *, weight_dtype=jnp.bfloat16):
    """Pad / stack / cast the Linear params once.

    params: list of (w, b) with w as (in_dim, out_dim), b as (1, out_dim);
            num_layer hidden layers followed by the output layer.
    Returns a dict reusable across every forward call.
    """
    num_layer = len(params) - 1
    assert num_layer >= 1
    w0, _ = params[0]
    wo, bo = params[-1]
    obs_dim, hidden = w0.shape
    action_dim = wo.shape[1]

    # v6e/v7x MXU is 2x256^2: pad realistic hiddens to 256 multiples; keep 128
    # for genuinely small hiddens (do not inflate 32 -> 256).
    hid_mult = 256 if hidden >= 256 else _LANE
    hid_p = _round_up(hidden, hid_mult)
    act_p = _round_up(action_dim, _LANE)

    def pad_w(w, rows, cols):
        w = jnp.asarray(w, jnp.float32)
        return jnp.pad(w, ((0, rows - w.shape[0]), (0, cols - w.shape[1]))
                       ).astype(weight_dtype)

    w0_p = pad_w(w0, obs_dim, hid_p)                      # (obs_dim, hid_p) bf16
    wh_p = None
    if num_layer > 1:                                     # (L-1, hid_p, hid_p) bf16
        wh_p = jnp.stack([pad_w(w, hid_p, hid_p) for (w, _) in params[1:num_layer]])
    wo_p = pad_w(wo, hid_p, act_p)                        # (hid_p, act_p) bf16

    # Biases stay f32 (tiny data, better accuracy); all hidden biases stacked
    # into a single operand.
    bh_p = jnp.stack([
        jnp.pad(jnp.asarray(b, jnp.float32).reshape(-1), (0, hid_p - b.size))
        for (_, b) in params[:num_layer]
    ])                                                    # (L, hid_p) f32
    bo_p = jnp.pad(jnp.asarray(bo, jnp.float32).reshape(1, -1),
                   ((0, 0), (0, act_p - action_dim)))     # (1, act_p) f32

    meta = dict(num_layer=num_layer, obs_dim=obs_dim, hidden=hidden,
                action_dim=action_dim, hid_p=hid_p, act_p=act_p)
    return dict(w0=w0_p, wh=wh_p, bh=bh_p, wo=wo_p, bo=bo_p, meta=meta)


# ---------------------------------------------------------------------------
# Fused MLP kernel: num_layer x (Linear -> ReLU) then Linear -> Tanh.
# ---------------------------------------------------------------------------
def _make_kernel(num_layer):
    def kernel(*refs):
        if num_layer > 1:
            x_ref, w0_ref, wh_ref, bh_ref, wo_ref, bo_ref, out_ref = refs
        else:
            x_ref, w0_ref, bh_ref, wo_ref, bo_ref, out_ref = refs
            wh_ref = None

        # Layer 0: (tile, obs_dim) bf16 x (obs_dim, hid_p) bf16 -> f32 acc.
        h = jnp.dot(x_ref[...], w0_ref[...], preferred_element_type=jnp.float32)
        h = jnp.maximum(h + bh_ref[0:1, :], 0.0)

        # Hidden layers 1..L-1 (unrolled at trace time; num_layer is static).
        for i in range(num_layer - 1):
            h = jnp.dot(h.astype(wh_ref.dtype), wh_ref[i],
                        preferred_element_type=jnp.float32)
            h = jnp.maximum(h + bh_ref[i + 1:i + 2, :], 0.0)

        # Output head + tanh. Lane-dense 128-wide store; padded lanes carry
        # tanh(0) = 0 because the padded weight columns / bias entries are 0.
        o = jnp.dot(h.astype(wo_ref.dtype), wo_ref[...],
                    preferred_element_type=jnp.float32) + bo_ref[...]
        out_ref[...] = jnp.tanh(o).astype(out_ref.dtype)

    return kernel


# ---------------------------------------------------------------------------
# Forward wrapper.
# ---------------------------------------------------------------------------
def state_bc_policy_forward(state, packed, *, max_batch_tile=1024):
    """state: (B, obs_dim) float32, packed: pack_params(...) -> (B, action_dim) f32."""
    meta = packed["meta"]
    num_layer = meta["num_layer"]
    obs_dim, action_dim = meta["obs_dim"], meta["action_dim"]
    hid_p, act_p = meta["hid_p"], meta["act_p"]

    B = state.shape[0]
    assert state.shape[1] == obs_dim

    # Batch padded only to a sublane multiple; the grid uses cdiv so the last
    # tile may be ragged (Pallas masks the out-of-range rows on the write, and
    # any garbage in padded input rows stays row-local and is sliced off).
    B_pad = _round_up(B, _SUBLANE)
    batch_tile = min(_round_up(max_batch_tile, _SUBLANE), B_pad)
    # TODO(synk): on v7x (2 TensorCores) pass max_batch_tile <= B/2 so the
    #             "parallel" grid axis has >= 2 steps and both cores get work.
    grid = (pl.cdiv(B_pad, batch_tile),)

    x = state.astype(jnp.bfloat16)
    if B_pad != B:
        x = jnp.pad(x, ((0, B_pad - B), (0, 0)))

    w0, wh, bh, wo, bo = (packed["w0"], packed["wh"], packed["bh"],
                          packed["wo"], packed["bo"])
    operands = [x, w0] + ([wh] if wh is not None else []) + [bh, wo, bo]
    kernel = _make_kernel(num_layer)

    # Cost / VMEM bookkeeping (conservative: double-buffered weights).
    weight_bytes = sum(int(op.size) * op.dtype.itemsize for op in operands[1:])
    flops = 2 * B_pad * (obs_dim * hid_p
                         + (num_layer - 1) * hid_p * hid_p
                         + hid_p * act_p)
    cost = pl.CostEstimate(
        flops=flops,
        transcendentals=B_pad * act_p,
        bytes_accessed=2 * B_pad * obs_dim + 4 * B_pad * act_p + weight_bytes)
    act_bytes = 2 * (batch_tile * obs_dim * 2) + 2 * (batch_tile * act_p * 4)
    scratch_bytes = 4 * batch_tile * hid_p * 4          # headroom for f32 temps
    vmem_limit = min(128 * 1024 * 1024,
                     max(32 * 1024 * 1024,
                         2 * weight_bytes + act_bytes + scratch_bytes + (4 << 20)))

    def _call(weight_pipeline_mode):
        def const_spec(shape):
            nd = len(shape)
            if weight_pipeline_mode is None:
                return pl.BlockSpec(shape, lambda i: (0,) * nd)
            # Constant block index + single buffer: fetched once, never doubled.
            return pl.BlockSpec(shape, lambda i: (0,) * nd,
                                pipeline_mode=weight_pipeline_mode)

        in_specs = [pl.BlockSpec((batch_tile, obs_dim), lambda i: (i, 0))]
        in_specs += [const_spec(op.shape) for op in operands[1:]]
        out_spec = pl.BlockSpec((batch_tile, act_p), lambda i: (i, 0))

        return pl.pallas_call(
            kernel,
            out_shape=jax.ShapeDtypeStruct((B_pad, act_p), jnp.float32),
            grid=grid,
            in_specs=in_specs,
            out_specs=out_spec,
            compiler_params=pltpu.CompilerParams(
                dimension_semantics=("parallel",),
                vmem_limit_bytes=int(vmem_limit)),
            cost_estimate=cost,
        )(*operands)

    try:
        # Single-buffer the resident weight operands (v7x VMEM headroom).
        out_p = _call(pl.Buffered(1))
    except Exception:  # older Pallas without BlockSpec.pipeline_mode / Buffered(1)
        out_p = _call(None)

    # Drop batch / lane padding.
    return out_p[:B, :action_dim]


# ---------------------------------------------------------------------------
# Deterministic init + pure-JAX f32 reference.
# ---------------------------------------------------------------------------
def init_params(key, obs_dim, hidden_dim, action_dim, num_layer=3):
    """nn.Linear-style params. Weights stored as (in_dim, out_dim), f32."""
    dims = [obs_dim] + [hidden_dim] * num_layer + [action_dim]
    params = []
    for i in range(len(dims) - 1):
        key, kw, kb = jax.random.split(key, 3)
        bound = 1.0 / jnp.sqrt(dims[i])
        w = jax.random.uniform(kw, (dims[i], dims[i + 1]),
                               minval=-bound, maxval=bound, dtype=jnp.float32)
        b = jax.random.uniform(kb, (1, dims[i + 1]),
                               minval=-bound, maxval=bound, dtype=jnp.float32)
        params.append((w, b))
    return params


def reference_forward(state, params):
    h = state
    for (w, b) in params[:-1]:
        h = jnp.maximum(h @ w + b, 0.0)
    wo, bo = params[-1]
    return jnp.tanh(h @ wo + bo)


if __name__ == "__main__":
    # Small shapes consistent with the module defaults:
    # num_layer=3, hidden_dim=256, small obs/action dims, small batch.
    B, obs_dim, hidden_dim, action_dim, num_layer = 16, 24, 256, 6, 3

    key = jax.random.PRNGKey(0)
    key, kx = jax.random.split(key)
    state = jax.random.normal(kx, (B, obs_dim), dtype=jnp.float32)
    params = init_params(key, obs_dim, hidden_dim, action_dim, num_layer)

    packed = pack_params(params)          # one-time packing (per checkpoint)

    out = state_bc_policy_forward(state, packed)
    out = jax.block_until_ready(out)

    ref = reference_forward(state, params)
    assert out.shape == (B, action_dim)
    # bf16 MXU inputs with f32 accumulation vs. pure-f32 reference.
    err = float(jnp.max(jnp.abs(out - ref)))
    assert err < 2e-2, f"mismatch vs reference: max abs err {err}"

    print("KERNEL_OK")
</pallas_src>

<mosaic_0001>
module attributes {stable_mosaic.version = 11 : i64} {
  func.func @kernel(%arg0: i32, %arg1: memref<16x24xbf16, #tpu.memory_space<vmem>>, %arg2: memref<24x256xbf16, #tpu.memory_space<vmem>>, %arg3: memref<2x256x256xbf16, #tpu.memory_space<vmem>>, %arg4: memref<3x256xf32, #tpu.memory_space<vmem>>, %arg5: memref<256x128xbf16, #tpu.memory_space<vmem>>, %arg6: memref<1x128xf32, #tpu.memory_space<vmem>>, %arg7: memref<16x128xf32, #tpu.memory_space<vmem>>) attributes {dimension_semantics = [#tpu.dimension_semantics<parallel>], iteration_bounds = array<i64: 1>, scalar_prefetch = 0 : i64, scratch_operands = 0 : i64, tpu.core_type = #tpu.core_type<tc>, window_params = [{transform_indices = @transform_0, window_bounds = array<i64: 16, 24>}, {pipeline_mode = #tpu.pipeline_mode<synchronous>, transform_indices = @transform_1, window_bounds = array<i64: 24, 256>}, {pipeline_mode = #tpu.pipeline_mode<synchronous>, transform_indices = @transform_2, window_bounds = array<i64: 2, 256, 256>}, {pipeline_mode = #tpu.pipeline_mode<synchronous>, transform_indices = @transform_3, window_bounds = array<i64: 3, 256>}, {pipeline_mode = #tpu.pipeline_mode<synchronous>, transform_indices = @transform_4, window_bounds = array<i64: 256, 128>}, {pipeline_mode = #tpu.pipeline_mode<synchronous>, transform_indices = @transform_5, window_bounds = array<i64: 1, 128>}, {transform_indices = @transform_6, window_bounds = array<i64: 16, 128>}]} {
    %c0 = arith.constant 0 : index
    %c0_0 = arith.constant 0 : index
    %0 = vector.load %arg1[%c0, %c0_0] : memref<16x24xbf16, #tpu.memory_space<vmem>>, vector<16x24xbf16>
    %c0_1 = arith.constant 0 : index
    %c0_2 = arith.constant 0 : index
    %1 = vector.load %arg2[%c0_1, %c0_2] : memref<24x256xbf16, #tpu.memory_space<vmem>>, vector<24x256xbf16>
    %cst = arith.constant dense<0.000000e+00> : vector<16x256xf32>
    %2 = tpu.matmul %0, %1, %cst {dimension_numbers = #tpu.dot_dimension_numbers<[1], [0], [0], [1], [0, 0, 1, 1], [], []>} : vector<16x24xbf16>, vector<24x256xbf16>, vector<16x256xf32> -> vector<16x256xf32>
    %c0_3 = arith.constant 0 : index
    %c0_4 = arith.constant 0 : index
    %3 = vector.load %arg4[%c0_3, %c0_4] : memref<3x256xf32, #tpu.memory_space<vmem>>, vector<1x256xf32>
    %4 = vector.broadcast %3 : vector<1x256xf32> to vector<16x256xf32>
    %5 = arith.addf %2, %4 : vector<16x256xf32>
    %cst_5 = arith.constant 0.000000e+00 : f32
    %6 = vector.broadcast %cst_5 : f32 to vector<16x256xf32>
    %7 = arith.maximumf %5, %6 : vector<16x256xf32>
    %8 = arith.truncf %7 : vector<16x256xf32> to vector<16x256xbf16>
    %c0_6 = arith.constant 0 : index
    %c0_7 = arith.constant 0 : index
    %c0_8 = arith.constant 0 : index
    %9 = vector.load %arg3[%c0_6, %c0_7, %c0_8] : memref<2x256x256xbf16, #tpu.memory_space<vmem>>, vector<1x256x256xbf16>
    %10 = vector.shape_cast %9 : vector<1x256x256xbf16> to vector<256x256xbf16>
    %cst_9 = arith.constant dense<0.000000e+00> : vector<16x256xf32>
    %11 = tpu.matmul %8, %10, %cst_9 {dimension_numbers = #tpu.dot_dimension_numbers<[1], [0], [0], [1], [0, 0, 1, 1], [], []>} : vector<16x256xbf16>, vector<256x256xbf16>, vector<16x256xf32> -> vector<16x256xf32>
    %c1 = arith.constant 1 : index
    %c0_10 = arith.constant 0 : index
    %12 = vector.load %arg4[%c1, %c0_10] : memref<3x256xf32, #tpu.memory_space<vmem>>, vector<1x256xf32>
    %13 = vector.broadcast %12 : vector<1x256xf32> to vector<16x256xf32>
    %14 = arith.addf %11, %13 : vector<16x256xf32>
    %cst_11 = arith.constant 0.000000e+00 : f32
    %15 = vector.broadcast %cst_11 : f32 to vector<16x256xf32>
    %16 = arith.maximumf %14, %15 : vector<16x256xf32>
    %17 = arith.truncf %16 : vector<16x256xf32> to vector<16x256xbf16>
    %c1_12 = arith.constant 1 : index
    %c0_13 = arith.constant 0 : index
    %c0_14 = arith.constant 0 : index
    %18 = vector.load %arg3[%c1_12, %c0_13, %c0_14] : memref<2x256x256xbf16, #tpu.memory_space<vmem>>, vector<1x256x256xbf16>
    %19 = vector.shape_cast %18 : vector<1x256x256xbf16> to vector<256x256xbf16>
    %cst_15 = arith.constant dense<0.000000e+00> : vector<16x256xf32>
    %20 = tpu.matmul %17, %19, %cst_15 {dimension_numbers = #tpu.dot_dimension_numbers<[1], [0], [0], [1], [0, 0, 1, 1], [], []>} : vector<16x256xbf16>, vector<256x256xbf16>, vector<16x256xf32> -> vector<16x256xf32>
    %c2 = arith.constant 2 : index
    %c0_16 = arith.constant 0 : index
    %21 = vector.load %arg4[%c2, %c0_16] : memref<3x256xf32, #tpu.memory_space<vmem>>, vector<1x256xf32>
    %22 = vector.broadcast %21 : vector<1x256xf32> to vector<16x256xf32>
    %23 = arith.addf %20, %22 : vector<16x256xf32>
    %cst_17 = arith.constant 0.000000e+00 : f32
    %24 = vector.broadcast %cst_17 : f32 to vector<16x256xf32>
    %25 = arith.maximumf %23, %24 : vector<16x256xf32>
    %26 = arith.truncf %25 : vector<16x256xf32> to vector<16x256xbf16>
    %c0_18 = arith.constant 0 : index
    %c0_19 = arith.constant 0 : index
    %27 = vector.load %arg5[%c0_18, %c0_19] : memref<256x128xbf16, #tpu.memory_space<vmem>>, vector<256x128xbf16>
    %cst_20 = arith.constant dense<0.000000e+00> : vector<16x128xf32>
    %28 = tpu.matmul %26, %27, %cst_20 {dimension_numbers = #tpu.dot_dimension_numbers<[1], [0], [0], [1], [0, 0, 1, 1], [], []>} : vector<16x256xbf16>, vector<256x128xbf16>, vector<16x128xf32> -> vector<16x128xf32>
    %c0_21 = arith.constant 0 : index
    %c0_22 = arith.constant 0 : index
    %29 = vector.load %arg6[%c0_21, %c0_22] : memref<1x128xf32, #tpu.memory_space<vmem>>, vector<1x128xf32>
    %30 = vector.broadcast %29 : vector<1x128xf32> to vector<16x128xf32>
    %31 = arith.addf %28, %30 : vector<16x128xf32>
    %32 = math.tanh %31 : vector<16x128xf32>
    %c0_23 = arith.constant 0 : index
    %c0_24 = arith.constant 0 : index
    %33 = vector.load %arg7[%c0_23, %c0_24] : memref<16x128xf32, #tpu.memory_space<vmem>>, vector<16x128xf32>
    tpu.vector_store %arg7[%c0_23, %c0_24], %32 {strides = array<i32>} : memref<16x128xf32, #tpu.memory_space<vmem>>, vector<16x128xf32>,
    return
  }
  func.func @transform_0(%arg0: i32) -> (i32, i32) {
    %c0_i32 = arith.constant 0 : i32
    %c0_i32_0 = arith.constant 0 : i32
    return %arg0, %c0_i32 : i32, i32
  }
  func.func @transform_1(%arg0: i32) -> (i32, i32) {
    %c0_i32 = arith.constant 0 : i32
    %c0_i32_0 = arith.constant 0 : i32
    %c0_i32_1 = arith.constant 0 : i32
    return %c0_i32, %c0_i32_0 : i32, i32
  }
  func.func @transform_2(%arg0: i32) -> (i32, i32, i32) {
    %c0_i32 = arith.constant 0 : i32
    %c0_i32_0 = arith.constant 0 : i32
    %c0_i32_1 = arith.constant 0 : i32
    %c0_i32_2 = arith.constant 0 : i32
    return %c0_i32, %c0_i32_0, %c0_i32_1 : i32, i32, i32
  }
  func.func @transform_3(%arg0: i32) -> (i32, i32) {
    %c0_i32 = arith.constant 0 : i32
    %c0_i32_0 = arith.constant 0 : i32
    %c0_i32_1 = arith.constant 0 : i32
    return %c0_i32, %c0_i32_0 : i32, i32
  }
  func.func @transform_4(%arg0: i32) -> (i32, i32) {
    %c0_i32 = arith.constant 0 : i32
    %c0_i32_0 = arith.constant 0 : i32
    %c0_i32_1 = arith.constant 0 : i32
    return %c0_i32, %c0_i32_0 : i32, i32
  }
  func.func @transform_5(%arg0: i32) -> (i32, i32) {
    %c0_i32 = arith.constant 0 : i32
    %c0_i32_0 = arith.constant 0 : i32
    %c0_i32_1 = arith.constant 0 : i32
    return %c0_i32, %c0_i32_0 : i32, i32
  }
  func.func @transform_6(%arg0: i32) -> (i32, i32) {
    %c0_i32 = arith.constant 0 : i32
    %c0_i32_0 = arith.constant 0 : i32
    return %arg0, %c0_i32 : i32, i32
  }
}

module attributes {stable_mosaic.version = 11 : i64} {
  func.func @kernel(%arg0: i32, %arg1: memref<16x24xbf16, #tpu.memory_space<vmem>>, %arg2: memref<24x256xbf16, #tpu.memory_space<vmem>>, %arg3: memref<2x256x256xbf16, #tpu.memory_space<vmem>>, %arg4: memref<3x256xf32, #tpu.memory_space<vmem>>, %arg5: memref<256x128xbf16, #tpu.memory_space<vmem>>, %arg6: memref<1x128xf32, #tpu.memory_space<vmem>>, %arg7: memref<16x128xf32, #tpu.memory_space<vmem>>) attributes {dimension_semantics = [#tpu.dimension_semantics<parallel>], iteration_bounds = array<i64: 1>, scalar_prefetch = 0 : i64, scratch_operands = 0 : i64, tpu.core_type = #tpu.core_type<tc>, window_params = [{transform_indices = @transform_0, window_bounds = array<i64: 16, 24>}, {pipeline_mode = #tpu.pipeline_mode<synchronous>, transform_indices = @transform_1, window_bounds = array<i64: 24, 256>}, {pipeline_mode = #tpu.pipeline_mode<synchronous>, transform_indices = @transform_2, window_bounds = array<i64: 2, 256, 256>}, {pipeline_mode = #tpu.pipeline_mode<synchronous>, transform_indices = @transform_3, window_bounds = array<i64: 3, 256>}, {pipeline_mode = #tpu.pipeline_mode<synchronous>, transform_indices = @transform_4, window_bounds = array<i64: 256, 128>}, {pipeline_mode = #tpu.pipeline_mode<synchronous>, transform_indices = @transform_5, window_bounds = array<i64: 1, 128>}, {transform_indices = @transform_6, window_bounds = array<i64: 16, 128>}]} {
    %c0 = arith.constant 0 : index
    %c0_0 = arith.constant 0 : index
    %0 = vector.load %arg1[%c0, %c0_0] : memref<16x24xbf16, #tpu.memory_space<vmem>>, vector<16x24xbf16>
    %c0_1 = arith.constant 0 : index
    %c0_2 = arith.constant 0 : index
    %1 = vector.load %arg2[%c0_1, %c0_2] : memref<24x256xbf16, #tpu.memory_space<vmem>>, vector<24x256xbf16>
    %cst = arith.constant dense<0.000000e+00> : vector<16x256xf32>
    %2 = tpu.matmul %0, %1, %cst {dimension_numbers = #tpu.dot_dimension_numbers<[1], [0], [0], [1], [0, 0, 1, 1], [], []>} : vector<16x24xbf16>, vector<24x256xbf16>, vector<16x256xf32> -> vector<16x256xf32>
    %c0_3 = arith.constant 0 : index
    %c0_4 = arith.constant 0 : index
    %3 = vector.load %arg4[%c0_3, %c0_4] : memref<3x256xf32, #tpu.memory_space<vmem>>, vector<1x256xf32>
    %4 = vector.broadcast %3 : vector<1x256xf32> to vector<16x256xf32>
    %5 = arith.addf %2, %4 : vector<16x256xf32>
    %cst_5 = arith.constant 0.000000e+00 : f32
    %6 = vector.broadcast %cst_5 : f32 to vector<16x256xf32>
    %7 = arith.maximumf %5, %6 : vector<16x256xf32>
    %8 = arith.truncf %7 : vector<16x256xf32> to vector<16x256xbf16>
    %c0_6 = arith.constant 0 : index
    %c0_7 = arith.constant 0 : index
    %c0_8 = arith.constant 0 : index
    %9 = vector.load %arg3[%c0_6, %c0_7, %c0_8] : memref<2x256x256xbf16, #tpu.memory_space<vmem>>, vector<1x256x256xbf16>
    %10 = vector.shape_cast %9 : vector<1x256x256xbf16> to vector<256x256xbf16>
    %cst_9 = arith.constant dense<0.000000e+00> : vector<16x256xf32>
    %11 = tpu.matmul %8, %10, %cst_9 {dimension_numbers = #tpu.dot_dimension_numbers<[1], [0], [0], [1], [0, 0, 1, 1], [], []>} : vector<16x256xbf16>, vector<256x256xbf16>, vector<16x256xf32> -> vector<16x256xf32>
    %c1 = arith.constant 1 : index
    %c0_10 = arith.constant 0 : index
    %12 = vector.load %arg4[%c1, %c0_10] : memref<3x256xf32, #tpu.memory_space<vmem>>, vector<1x256xf32>
    %13 = vector.broadcast %12 : vector<1x256xf32> to vector<16x256xf32>
    %14 = arith.addf %11, %13 : vector<16x256xf32>
    %cst_11 = arith.constant 0.000000e+00 : f32
    %15 = vector.broadcast %cst_11 : f32 to vector<16x256xf32>
    %16 = arith.maximumf %14, %15 : vector<16x256xf32>
    %17 = arith.truncf %16 : vector<16x256xf32> to vector<16x256xbf16>
    %c1_12 = arith.constant 1 : index
    %c0_13 = arith.constant 0 : index
    %c0_14 = arith.constant 0 : index
    %18 = vector.load %arg3[%c1_12, %c0_13, %c0_14] : memref<2x256x256xbf16, #tpu.memory_space<vmem>>, vector<1x256x256xbf16>
    %19 = vector.shape_cast %18 : vector<1x256x256xbf16> to vector<256x256xbf16>
    %cst_15 = arith.constant dense<0.000000e+00> : vector<16x256xf32>
    %20 = tpu.matmul %17, %19, %cst_15 {dimension_numbers = #tpu.dot_dimension_numbers<[1], [0], [0], [1], [0, 0, 1, 1], [], []>} : vector<16x256xbf16>, vector<256x256xbf16>, vector<16x256xf32> -> vector<16x256xf32>
    %c2 = arith.constant 2 : index
    %c0_16 = arith.constant 0 : index
    %21 = vector.load %arg4[%c2, %c0_16] : memref<3x256xf32, #tpu.memory_space<vmem>>, vector<1x256xf32>
    %22 = vector.broadcast %21 : vector<1x256xf32> to vector<16x256xf32>
    %23 = arith.addf %20, %22 : vector<16x256xf32>
    %cst_17 = arith.constant 0.000000e+00 : f32
    %24 = vector.broadcast %cst_17 : f32 to vector<16x256xf32>
    %25 = arith.maximumf %23, %24 : vector<16x256xf32>
    %26 = arith.truncf %25 : vector<16x256xf32> to vector<16x256xbf16>
    %c0_18 = arith.constant 0 : index
    %c0_19 = arith.constant 0 : index
    %27 = vector.load %arg5[%c0_18, %c0_19] : memref<256x128xbf16, #tpu.memory_space<vmem>>, vector<256x128xbf16>
    %cst_20 = arith.constant dense<0.000000e+00> : vector<16x128xf32>
    %28 = tpu.matmul %26, %27, %cst_20 {dimension_numbers = #tpu.dot_dimension_numbers<[1], [0], [0], [1], [0, 0, 1, 1], [], []>} : vector<16x256xbf16>, vector<256x128xbf16>, vector<16x128xf32> -> vector<16x128xf32>
    %c0_21 = arith.constant 0 : index
    %c0_22 = arith.constant 0 : index
    %29 = vector.load %arg6[%c0_21, %c0_22] : memref<1x128xf32, #tpu.memory_space<vmem>>, vector<1x128xf32>
    %30 = vector.broadcast %29 : vector<1x128xf32> to vector<16x128xf32>
    %31 = arith.addf %28, %30 : vector<16x128xf32>
    %32 = math.tanh %31 : vector<16x128xf32>
    %c0_23 = arith.constant 0 : index
    %c0_24 = arith.constant 0 : index
    %33 = vector.load %arg7[%c0_23, %c0_24] : memref<16x128xf32, #tpu.memory_space<vmem>>, vector<16x128xf32>
    tpu.vector_store %arg7[%c0_23, %c0_24], %32 {strides = array<i32>} : memref<16x128xf32, #tpu.memory_space<vmem>>, vector<16x128xf32>,
    return
  }
  func.func @transform_0(%arg0: i32) -> (i32, i32) {
    %c0_i32 = arith.constant 0 : i32
    %c0_i32_0 = arith.constant 0 : i32
    return %arg0, %c0_i32 : i32, i32
  }
  func.func @transform_1(%arg0: i32) -> (i32, i32) {
    %c0_i32 = arith.constant 0 : i32
    %c0_i32_0 = arith.constant 0 : i32
    %c0_i32_1 = arith.constant 0 : i32
    return %c0_i32, %c0_i32_0 : i32, i32
  }
  func.func @transform_2(%arg0: i32) -> (i32, i32, i32) {
    %c0_i32 = arith.constant 0 : i32
    %c0_i32_0 = arith.constant 0 : i32
    %c0_i32_1 = arith.constant 0 : i32
    %c0_i32_2 = arith.constant 0 : i32
    return %c0_i32, %c0_i32_0, %c0_i32_1 : i32, i32, i32
  }
  func.func @transform_3(%arg0: i32) -> (i32, i32) {
    %c0_i32 = arith.constant 0 : i32
    %c0_i32_0 = arith.constant 0 : i32
    %c0_i32_1 = arith.constant 0 : i32
    return %c0_i32, %c0_i32_0 : i32, i32
  }
  func.func @transform_4(%arg0: i32) -> (i32, i32) {
    %c0_i32 = arith.constant 0 : i32
    %c0_i32_0 = arith.constant 0 : i32
    %c0_i32_1 = arith.constant 0 : i32
    return %c0_i32, %c0_i32_0 : i32, i32
  }
  func.func @transform_5(%arg0: i32) -> (i32, i32) {
    %c0_i32 = arith.constant 0 : i32
    %c0_i32_0 = arith.constant 0 : i32
    %c0_i32_1 = arith.constant 0 : i32
    return %c0_i32, %c0_i32_0 : i32, i32
  }
  func.func @transform_6(%arg0: i32) -> (i32, i32) {
    %c0_i32 = arith.constant 0 : i32
    %c0_i32_0 = arith.constant 0 : i32
    return %arg0, %c0_i32 : i32, i32
  }
}

</mosaic_0001>

<bundles_post_ra>
// kernel: tpu_custom_call.1
= control target key start
LH: loop header
LB: loop body
LE: loop exit
PB: predicated region body
PF: predicated region fallthrough
CT: control target
= control target key end

     0   :  { %11 = vsyncpa [#allocation3], 0  ;;  %s1396_s0 = inlined_call_operand.hbm [shape: bf16[16,24], index: 0, kind: input, shape index: {}]   ;;  %s1397_s1 = inlined_call_operand.hbm [shape: bf16[24,256], index: 1, kind: input, shape index: {}]   ;;  %s1398_s2 = inlined_call_operand.hbm [shape: bf16[2,256,256], index: 2, kind: input, shape index: {}]   ;;  %s1399_s3 = inlined_call_operand.vmem [shape: f32[3,256], index: 3, kind: input, shape index: {}]   ;;  %s1400_s4 = inlined_call_operand.hbm [shape: bf16[256,128], index: 4, kind: input, shape index: {}]   ;;  %s1401_s5 = inlined_call_operand.vmem [shape: f32[1,128], index: 5, kind: input, shape index: {}]   ;;  %s1402_s6 = inlined_call_operand.hbm [shape: f32[16,128], index: 6, kind: output, shape index: {}]  }
   0x1   :  { %12 = vsyncpa [#allocation6], 0 }
   0x2   :  { %13 = vsyncpa [#allocation9], 0 }
   0x3   :  { %14 = vsyncpa [#allocation4], 0  ;;  %s1247_s21 = smov [#allocation5]   ;;  %s1129_s25 = scalar_lea.hbm %s1397_s1, 384 }
   0x4   :  { %s32_s22 = sshll.u32 %s1247_s21, 4  ;;  %p1130_p0 = scmp.ne.s32.totalorder %s1397_s1, %s1129_s25  ;;  %s33_s22 = int_to_ptr.vmem [resolvable:$true] %s32_s22 }
   0x5   :  { %p1133_p1 = scmp.lt.u32.totalorder %s1129_s25, %s1397_s1 }
   0x7   :  { %p1135_p2 = pnand %p1133_p1, %p1130_p0 }
   0x9   :  { %1138 = shalt.err (!%p1135_p2)
}
   0xa   :  { %s1139_s30 = scalar_lea.vmem %s33_s22, 384  ;;  %p1144_p4 = scmp.lt.s32.totalorder %s33_s22, %s33_s22 }
   0xb   :  { %p1140_p3 = scmp.ne.s32.totalorder %s33_s22, %s1139_s30  ;;  %p1145_p5 = scmp.lt.s32.totalorder %s1139_s30, %s1139_s30 }
   0xd   :  { %p1146_p6 = por %p1145_p5, %p1144_p4 }
   0xf   :  { %p1147_p7 = pnand %p1146_p6, %p1140_p3 }
  0x11   :  { %1150 = shalt.err (!%p1147_p7)
}
  0x12   :  { %s1248_s7 = smov 128   ;;  %s1249_s8 = smov 8  }
  0x13   :  { %38 = dma.hbm_to_vmem [thread:$0]  %s1397_s1, 384, %s33_s22, [#allocation6], %s1248_s7, %s1248_s7, %s1249_s8  }
  0x14   :  { %s1250_s11 = smov [#allocation2]   ;;  %s1151_s15 = scalar_lea.hbm %s1396_s0, 128 }
  0x15   :  { %s20_s12 = sshll.u32 %s1250_s11, 4  ;;  %p1152_p8 = scmp.ne.s32.totalorder %s1396_s0, %s1151_s15  ;;  %s21_s12 = int_to_ptr.vmem [resolvable:$true] %s20_s12 }
  0x16   :  { %p1155_p9 = scmp.lt.u32.totalorder %s1151_s15, %s1396_s0 }
  0x18   :  { %p1157_p10 = pnand %p1155_p9, %p1152_p8 }
  0x1a   :  { %1160 = shalt.err (!%p1157_p10)
}
  0x1b   :  { %s1161_s20 = scalar_lea.vmem %s21_s12, 128  ;;  %p1166_p12 = scmp.lt.s32.totalorder %s21_s12, %s21_s12 }
  0x1c   :  { %p1162_p11 = scmp.ne.s32.totalorder %s21_s12, %s1161_s20  ;;  %p1167_p13 = scmp.lt.s32.totalorder %s1161_s20, %s1161_s20 }
  0x1e   :  { %p1168_p0 = por %p1167_p13, %p1166_p12 }
  0x20   :  { %p1169_p1 = pnand %p1168_p0, %p1162_p11 }
  0x22   :  { %1172 = shalt.err (!%p1169_p1)
}
  0x23   :  { %s1251_s1 = smov 64   ;;  %s1252_s21 = smov 4  }
  0x24   :  { %26 = dma.hbm_to_vmem [thread:$0]  %s1396_s0, 128, %s21_s12, [#allocation3], %s1251_s1, %s1251_s1, %s1252_s21  }
  0x25   :  { %s1253_s24 = smov [#allocation7]   ;;  %s1254_s26 = smov [#allocation8]  }
  0x26   :  { %s44_s25 = sshll.u32 %s1253_s24, 4  ;;  %s58_s27 = sshll.u32 %s1254_s26, 4  ;;  %s45_s25 = int_to_ptr.vmem [resolvable:$true] %s44_s25  ;;  %s1322_s27 = int_to_ptr.vmem [resolvable:$true] %s58_s27 }
  0x27   :  { %s1173_s30 = scalar_lea.hbm %s1398_s2, 8192 }
  0x28   :  { %p1174_p2 = scmp.ne.s32.totalorder %s1398_s2, %s1173_s30  ;;  %p1177_p3 = scmp.lt.u32.totalorder %s1173_s30, %s1398_s2 }
  0x2a   :  { %p1179_p4 = pnand %p1177_p3, %p1174_p2 }
  0x2c   :  { %1182 = shalt.err (!%p1179_p4)
}
  0x2d   :  { %s1183_s0 = scalar_lea.vmem %s45_s25, 8192  ;;  %p1188_p6 = scmp.lt.s32.totalorder %s45_s25, %s45_s25 }
  0x2e   :  { %p1184_p5 = scmp.ne.s32.totalorder %s45_s25, %s1183_s0  ;;  %p1189_p7 = scmp.lt.s32.totalorder %s1183_s0, %s1183_s0 }
  0x30   :  { %p1190_p8 = por %p1189_p7, %p1188_p6 }
  0x32   :  { %p1191_p9 = pnand %p1190_p8, %p1184_p5 }
  0x34   :  { %1194 = shalt.err (!%p1191_p9)
}
  0x35   :  { %50 = dma.hbm_to_vmem [thread:$0]  %s1398_s2, 8192, %s45_s25, [#allocation6], %s1248_s7, %s1248_s7, %s1249_s8  }
  0x36   :  { %s1195_s17 = scalar_lea.hbm %s1400_s4, 2048 }
  0x37   :  { %p1196_p10 = scmp.ne.s32.totalorder %s1400_s4, %s1195_s17  ;;  %p1199_p11 = scmp.lt.u32.totalorder %s1195_s17, %s1400_s4 }
  0x39   :  { %p1201_p12 = pnand %p1199_p11, %p1196_p10 }
  0x3b   :  { %1204 = shalt.err (!%p1201_p12)
}
  0x3c   :  { %s1205_s23 = scalar_lea.vmem %s1322_s27, 2048  ;;  %p1210_p0 = scmp.lt.s32.totalorder %s1322_s27, %s1322_s27 }
  0x3d   :  { %p1206_p13 = scmp.ne.s32.totalorder %s1322_s27, %s1205_s23  ;;  %p1211_p1 = scmp.lt.s32.totalorder %s1205_s23, %s1205_s23 }
  0x3f   :  { %p1212_p2 = por %p1211_p1, %p1210_p0 }
  0x41   :  { %p1213_p3 = pnand %p1212_p2, %p1206_p13 }
  0x43   :  { %1216 = shalt.err (!%p1213_p3)
}
  0x44   :  { %64 = dma.hbm_to_vmem [thread:$0]  %s1400_s4, 2048, %s1322_s27, [#allocation9], %s1251_s1, %s1251_s1, %s1252_s21  }
  0x45   :  { %1239 = dma.done.wait [#allocation3], 128  }
  0x46   :  { %1240 = vsyncadd [#allocation3], 4294967168 }
  0x47   :  { %1241 = dma.done.wait [#allocation6], 8576  }
  0x48   :  { %1242 = vsyncadd [#allocation6], 4294958720 }
  0x49   :  { %1243 = dma.done.wait [#allocation9], 2048  }
  0x4a   :  { %1244 = vsyncadd [#allocation9], 4294965248  ;;  %v1255_v0 = vmov 0   ;;  %v1007_v1 = vld [vmem:[#allocation5 + $0x4] ss:$8 sps:$4 sm:$0xff]   ;;  %v84_v3 = vld [vmem:[#allocation5 + $0x10] sm:$0xff] }
  0x4b   :  { %160 = vmatprep.mubr.bf16.mxu0 %v1255_v0  ;;  %v1009_v2 = vld [vmem:[#allocation5] ss:$8 sps:$4 sm:$0xff]   ;;  %vm121_vm0 = vcmask 1043456   ;;  %128 = vmatprep.subr.bf16.mxu0 %v1007_v1  ;;  %v889_v4 = vcombine.high %v84_v3, %v84_v3  ;;  %v888_v5 = vcombine.low %v84_v3, %v84_v3  ;;  %v1013_v6 = vld [vmem:[#allocation7 + $0x4] ss:$8 sps:$4 sm:$0xff]   ;;  %vm117_vm1 = vcmask 195584  }
  0x4c   :  { %129 = vmatpush1.bf16.msra.mxu0 %v1009_v2  ;;  %v1015_v7 = vld [vmem:[#allocation7] ss:$8 sps:$4 sm:$0xff]   ;;  %v1016_v9 = vld [vmem:[#allocation7 + $0x14] ss:$8 sps:$4 sm:$0xff]   ;;  %382 = vmatprep.subr.bf16.mxu1 %v1013_v6  ;;  %v1018_v11 = vld [vmem:[#allocation7 + $0x10] ss:$8 sps:$4 sm:$0xff]  }
  0x4d   :  { %890 = vmatprep.subr.msk.bf16.mxu0 %vm121_vm0, %v889_v4  ;;  %v123_v8 = vsel %vm121_vm0, %v888_v5, 0  ;;  %v1012_v10 = vld [vmem:[#allocation2] sm:$0xff]   ;;  %383 = vmatpush1.bf16.msra.mxu1 %v1015_v7  ;;  %v1022_v14 = vld [vmem:[#allocation7 + $0x34] ss:$8 sps:$4 sm:$0xff]   ;;  %v1024_v15 = vld [vmem:[#allocation7 + $0x30] ss:$8 sps:$4 sm:$0xff]   ;;  %v87_v4 = vlaneseq }
  0x4e   :  { %384 = vmatprep.subr.bf16.mxu1 %v1016_v9  ;;  %v1019_v12 = vld [vmem:[#allocation7 + $0x24] ss:$8 sps:$4 sm:$0xff]   ;;  %v1021_v13 = vld [vmem:[#allocation7 + $0x20] ss:$8 sps:$4 sm:$0xff]   ;;  %v1028_v18 = vld [vmem:[#allocation7 + $0x54] ss:$8 sps:$4 sm:$0xff]  }
  0x4f   :  { %v1025_v16 = vld [vmem:[#allocation7 + $0x44] ss:$8 sps:$4 sm:$0xff]   ;;  %v1027_v17 = vld [vmem:[#allocation7 + $0x40] ss:$8 sps:$4 sm:$0xff]   ;;  %v1030_v19 = vld [vmem:[#allocation7 + $0x50] ss:$8 sps:$4 sm:$0xff]  }
  0x50   :  { %131 = vmatpush1.bf16.msra.mxu0 %v123_v8  ;;  %v1031_v20 = vld [vmem:[#allocation7 + $0x64] ss:$8 sps:$4 sm:$0xff]   ;;  %v1033_v21 = vld [vmem:[#allocation7 + $0x60] ss:$8 sps:$4 sm:$0xff]   ;;  %v1034_v22 = vld [vmem:[#allocation7 + $0x74] ss:$8 sps:$4 sm:$0xff]  }
  0x51   :  { %385 = vmatpush1.bf16.msra.mxu1 %v1018_v11  ;;  %v1036_v23 = vld [vmem:[#allocation7 + $0x70] ss:$8 sps:$4 sm:$0xff]   ;;  %v1037_v24 = vld [vmem:[#allocation7 + $0x84] ss:$8 sps:$4 sm:$0xff]   ;;  %v1039_v25 = vld [vmem:[#allocation7 + $0x80] ss:$8 sps:$4 sm:$0xff]  }
  0x52   :  { %386 = vmatprep.subr.bf16.mxu1 %v1019_v12  ;;  %v1040_v26 = vld [vmem:[#allocation7 + $0x94] ss:$8 sps:$4 sm:$0xff]   ;;  %v1042_v27 = vld [vmem:[#allocation7 + $0x90] ss:$8 sps:$4 sm:$0xff]   ;;  %v1043_v28 = vld [vmem:[#allocation7 + $0xa4] ss:$8 sps:$4 sm:$0xff]  }
  0x53   :  { %891 = vmatmul.mubr.msk.bf16.vlgmr.msra.gmra.mrb[0].mxu0 %vm117_vm1, %v1012_v10  ;;  %v1045_v29 = vld [vmem:[#allocation7 + $0xa0] ss:$8 sps:$4 sm:$0xff]   ;;  %v1046_v30 = vld [vmem:[#allocation7 + $0xb4] ss:$8 sps:$4 sm:$0xff]   ;;  %v1048_v31 = vld [vmem:[#allocation7 + $0xb0] ss:$8 sps:$4 sm:$0xff]  }
  0x54   :  { %v1049_v32 = vld [vmem:[#allocation7 + $0xc4] ss:$8 sps:$4 sm:$0xff]   ;;  %v1051_v33 = vld [vmem:[#allocation7 + $0xc0] ss:$8 sps:$4 sm:$0xff]   ;;  %v1052_v34 = vld [vmem:[#allocation7 + $0xd4] ss:$8 sps:$4 sm:$0xff]  }
  0x55   :  { %387 = vmatpush1.bf16.msra.mxu1 %v1021_v13  ;;  %v1054_v35 = vld [vmem:[#allocation7 + $0xd0] ss:$8 sps:$4 sm:$0xff]   ;;  %v1055_v36 = vld [vmem:[#allocation7 + $0xe4] ss:$8 sps:$4 sm:$0xff]   ;;  %v1057_v37 = vld [vmem:[#allocation7 + $0xe0] ss:$8 sps:$4 sm:$0xff]  }
  0x56   :  { %388 = vmatprep.subr.bf16.mxu1 %v1022_v14  ;;  %v1058_v38 = vld [vmem:[#allocation7 + $0xf4] ss:$8 sps:$4 sm:$0xff]   ;;  %v1060_v39 = vld [vmem:[#allocation7 + $0xf0] ss:$8 sps:$4 sm:$0xff]   ;;  %v1061_v40 = vld [vmem:[#allocation7 + $0x100] ss:$8 sps:$4 sm:$0xff]  }
  0x57   :  { %v1063_v41 = vld [vmem:[#allocation7 + $0x104] ss:$8 sps:$4 sm:$0xff]   ;;  %v1066_v42 = vld [vmem:[#allocation7 + $0x114] ss:$8 sps:$4 sm:$0xff]   ;;  %v1064_v43 = vld [vmem:[#allocation7 + $0x110] ss:$8 sps:$4 sm:$0xff]  }
  0x58   :  { %637 = vmatprep.subr.bf16.mxu0 %v1063_v41  ;;  %v1069_v44 = vld [vmem:[#allocation7 + $0x124] ss:$8 sps:$4 sm:$0xff]   ;;  %v1067_v45 = vld [vmem:[#allocation7 + $0x120] ss:$8 sps:$4 sm:$0xff]   ;;  %v1072_v46 = vld [vmem:[#allocation7 + $0x134] ss:$8 sps:$4 sm:$0xff]  }
  0x59   :  { %389 = vmatpush1.bf16.msra.mxu1 %v1024_v15  ;;  %638 = vmatpush1.bf16.msra.mxu0 %v1061_v40  ;;  %v1070_v47 = vld [vmem:[#allocation7 + $0x130] ss:$8 sps:$4 sm:$0xff]   ;;  %v1075_v48 = vld [vmem:[#allocation7 + $0x144] ss:$8 sps:$4 sm:$0xff]   ;;  %v1073_v49 = vld [vmem:[#allocation7 + $0x140] ss:$8 sps:$4 sm:$0xff]  }
  0x5a   :  { %390 = vmatprep.subr.bf16.mxu1 %v1025_v16  ;;  %639 = vmatprep.subr.bf16.mxu0 %v1066_v42  ;;  %v1078_v50 = vld [vmem:[#allocation7 + $0x154] ss:$8 sps:$4 sm:$0xff]   ;;  %v1076_v51 = vld [vmem:[#allocation7 + $0x150] ss:$8 sps:$4 sm:$0xff]   ;;  %v1081_v52 = vld [vmem:[#allocation7 + $0x164] ss:$8 sps:$4 sm:$0xff]  }
  0x5b   :  { %v1079_v53 = vld [vmem:[#allocation7 + $0x160] ss:$8 sps:$4 sm:$0xff]   ;;  %v1084_v54 = vld [vmem:[#allocation7 + $0x174] ss:$8 sps:$4 sm:$0xff]   ;;  %v1082_v55 = vld [vmem:[#allocation7 + $0x170] ss:$8 sps:$4 sm:$0xff]  }
  0x5c   :  { %v1087_v56 = vld [vmem:[#allocation7 + $0x184] ss:$8 sps:$4 sm:$0xff]   ;;  %v1085_v57 = vld [vmem:[#allocation7 + $0x180] ss:$8 sps:$4 sm:$0xff]   ;;  %v1090_v58 = vld [vmem:[#allocation7 + $0x194] ss:$8 sps:$4 sm:$0xff]  }
  0x5d   :  { %391 = vmatpush1.bf16.msra.mxu1 %v1027_v17  ;;  %640 = vmatpush1.bf16.msra.mxu0 %v1064_v43  ;;  %v1088_v59 = vld [vmem:[#allocation7 + $0x190] ss:$8 sps:$4 sm:$0xff]   ;;  %v1093_v60 = vld [vmem:[#allocation7 + $0x1a4] ss:$8 sps:$4 sm:$0xff]   ;;  %v1091_v61 = vld [vmem:[#allocation7 + $0x1a0] ss:$8 sps:$4 sm:$0xff]  }
  0x5e   :  { %392 = vmatprep.subr.bf16.mxu1 %v1028_v18  ;;  %641 = vmatprep.subr.bf16.mxu0 %v1069_v44  ;;  %v1096_v62 = vld [vmem:[#allocation7 + $0x1b4] ss:$8 sps:$4 sm:$0xff]   ;;  %v1094_v63 = vld [vmem:[#allocation7 + $0x1b0] ss:$8 sps:$4 sm:$0xff]   ;;  %v1099_v0 = vld [vmem:[#allocation7 + $0x1c4] ss:$8 sps:$4 sm:$0xff]  }
  0x5f   :  { %v1097_v1 = vld [vmem:[#allocation7 + $0x1c0] ss:$8 sps:$4 sm:$0xff]   ;;  %v1102_v2 = vld [vmem:[#allocation7 + $0x1d4] ss:$8 sps:$4 sm:$0xff]   ;;  %v1100_v3 = vld [vmem:[#allocation7 + $0x1d0] ss:$8 sps:$4 sm:$0xff]  }
  0x60   :  { %v88_v5 = vshrl.u32 %v87_v4, 7  ;;  %v85_v7 = vld [vmem:[%s1399_s3] ss:$4 sm:$0x3]  ;;  %s1256_s29 = smov [#allocation10]  }
  0x61   :  { %393 = vmatpush1.bf16.msra.mxu1 %v1030_v19  ;;  %642 = vmatpush1.bf16.msra.mxu0 %v1067_v45  ;;  %v892_v40 = vld [vmem:[%s1399_s3 + $0x1] ss:$4 sm:$0x3]  ;;  %s871_s30 = sshll.u32 %s1256_s29, 4  ;;  %s872_s30 = int_to_ptr.vmem [resolvable:$true] %s871_s30 }
  0x62   :  { %394 = vmatprep.subr.bf16.mxu1 %v1031_v20  ;;  %643 = vmatprep.subr.bf16.mxu0 %v1072_v46  ;;  %v1359_v6 = vsub.s32 0, %v88_v5  ;;  %v1364_v8 = vsub.s32 1, %v88_v5  ;;  %s1217_s9 = scalar_lea.vmem %s872_s30, 256  ;;  %p1222_p5 = scmp.lt.s32.totalorder %s872_s30, %s872_s30 }
  0x63   :  { %p1218_p4 = scmp.ne.s32.totalorder %s872_s30, %s1217_s9  ;;  %p1223_p6 = scmp.lt.s32.totalorder %s1217_s9, %s1217_s9 }
  0x64   :  { %v90_v9 = vrot.slane %v85_v7, %v1359_v6  ;;  %v94_v10 = vrot.slane %v85_v7, %v1364_v8  ;;  %v215_v41 = vrot.slane %v892_v40, %v1359_v6  ;;  %v219_v42 = vrot.slane %v892_v40, %v1364_v8 }
  0x65   :  { %395 = vmatpush1.bf16.msra.mxu1 %v1033_v21  ;;  %644 = vmatpush1.bf16.msra.mxu0 %v1070_v47  ;;  %p1224_p7 = por %p1223_p6, %p1222_p5 }
  0x66   :  { %396 = vmatprep.subr.bf16.mxu1 %v1034_v22  ;;  %645 = vmatprep.subr.bf16.mxu0 %v1075_v48 }
  0x67   :  { %p1225_p8 = pnand %p1224_p7, %p1218_p4 }
  0x69   :  { %397 = vmatpush1.bf16.msra.mxu1 %v1036_v23  ;;  %646 = vmatpush1.bf16.msra.mxu0 %v1073_v49 }
  0x6a   :  { %398 = vmatprep.subr.bf16.mxu1 %v1037_v24  ;;  %647 = vmatprep.subr.bf16.mxu0 %v1078_v50 }
  0x6d   :  { %399 = vmatpush1.bf16.msra.mxu1 %v1039_v25  ;;  %648 = vmatpush1.bf16.msra.mxu0 %v1076_v51  ;;  %v1105_v25 = vld [vmem:[#allocation7 + $0x1e4] ss:$8 sps:$4 sm:$0xff]  }
  0x6e   :  { %400 = vmatprep.subr.bf16.mxu1 %v1040_v26  ;;  %649 = vmatprep.subr.bf16.mxu0 %v1081_v52  ;;  %v1103_v26 = vld [vmem:[#allocation7 + $0x1e0] ss:$8 sps:$4 sm:$0xff]  }
  0x71   :  { %401 = vmatpush1.bf16.msra.mxu1 %v1042_v27  ;;  %650 = vmatpush1.bf16.msra.mxu0 %v1079_v53  ;;  %v1108_v27 = vld [vmem:[#allocation7 + $0x1f4] ss:$8 sps:$4 sm:$0xff]  }
  0x72   :  { %402 = vmatprep.subr.bf16.mxu1 %v1043_v28  ;;  %651 = vmatprep.subr.bf16.mxu0 %v1084_v54  ;;  %v1106_v28 = vld [vmem:[#allocation7 + $0x1f0] ss:$8 sps:$4 sm:$0xff]  }
  0x75   :  { %403 = vmatpush1.bf16.msra.mxu1 %v1045_v29  ;;  %652 = vmatpush1.bf16.msra.mxu0 %v1082_v55  ;;  %v1109_v29 = vld [vmem:[#allocation8 + $0x40] sm:$0xff]  }
  0x76   :  { %404 = vmatprep.subr.bf16.mxu1 %v1046_v30  ;;  %653 = vmatprep.subr.bf16.mxu0 %v1087_v56  ;;  %v1110_v30 = vld [vmem:[#allocation8] sm:$0xff]  }
  0x79   :  { %405 = vmatpush1.bf16.msra.mxu1 %v1048_v31  ;;  %654 = vmatpush1.bf16.msra.mxu0 %v1085_v57  ;;  %v1111_v31 = vld [vmem:[#allocation8 + $0x48] sm:$0xff]  }
  0x7a   :  { %406 = vmatprep.subr.bf16.mxu1 %v1049_v32  ;;  %655 = vmatprep.subr.bf16.mxu0 %v1090_v58  ;;  %v1112_v32 = vld [vmem:[#allocation8 + $0x8] sm:$0xff]   ;;  %v1121_v58 = vld [vmem:[#allocation8 + $0x70] sm:$0xff]  }
  0x7b   :  { %v1120_v57 = vld [vmem:[#allocation8 + $0x28] sm:$0xff]  }
  0x7d   :  { %407 = vmatpush1.bf16.msra.mxu1 %v1051_v33  ;;  %656 = vmatpush1.bf16.msra.mxu0 %v1088_v59  ;;  %v1113_v33 = vld [vmem:[#allocation8 + $0x50] sm:$0xff]  }
  0x7e   :  { %408 = vmatprep.subr.bf16.mxu1 %v1052_v34  ;;  %657 = vmatprep.subr.bf16.mxu0 %v1093_v60  ;;  %v1114_v34 = vld [vmem:[#allocation8 + $0x10] sm:$0xff]   ;;  %v1123_v60 = vld [vmem:[#allocation8 + $0x78] sm:$0xff]  }
  0x7f   :  { %v1122_v59 = vld [vmem:[#allocation8 + $0x30] sm:$0xff]  }
  0x81   :  { %409 = vmatpush1.bf16.msra.mxu1 %v1054_v35  ;;  %658 = vmatpush1.bf16.msra.mxu0 %v1091_v61  ;;  %v1115_v35 = vld [vmem:[#allocation8 + $0x58] sm:$0xff]  }
  0x82   :  { %410 = vmatprep.subr.bf16.mxu1 %v1055_v36  ;;  %659 = vmatprep.subr.bf16.mxu0 %v1096_v62  ;;  %v1116_v36 = vld [vmem:[#allocation8 + $0x18] sm:$0xff]   ;;  %v925_v62 = vld [vmem:[%s1399_s3 + $0x2] ss:$4 sm:$0x3] }
  0x83   :  { %v1124_v61 = vld [vmem:[#allocation8 + $0x38] sm:$0xff]  }
  0x85   :  { %411 = vmatpush1.bf16.msra.mxu1 %v1057_v37  ;;  %660 = vmatpush1.bf16.msra.mxu0 %v1094_v63  ;;  %v1117_v37 = vld [vmem:[#allocation8 + $0x60] sm:$0xff]   ;;  %v470_v63 = vrot.slane %v925_v62, %v1359_v6 }
  0x86   :  { %412 = vmatprep.subr.bf16.mxu1 %v1058_v38  ;;  %661 = vmatprep.subr.bf16.mxu0 %v1099_v0  ;;  %v1118_v38 = vld [vmem:[#allocation8 + $0x20] sm:$0xff]   ;;  %v474_v0 = vrot.slane %v925_v62, %v1364_v8 }
  0x87   :  { %v958_v6 = vld [vmem:[%s1401_s5] ss:$0 sm:$0xff] }
  0x89   :  { %413 = vmatpush1.bf16.msra.mxu1 %v1060_v39  ;;  %662 = vmatpush1.bf16.msra.mxu0 %v1097_v1  ;;  %v1119_v39 = vld [vmem:[#allocation8 + $0x68] sm:$0xff]  }
  0x8a   :  { %663 = vmatprep.subr.bf16.mxu0 %v1102_v2  ;;  %975 = vmatprep.subr.bf16.mxu1 %v1109_v29 }
  0x8d   :  { %664 = vmatpush1.bf16.msra.mxu0 %v1100_v3 }
  0x8e   :  { %665 = vmatprep.subr.bf16.mxu0 %v1105_v25 }
  0x91   :  { %666 = vmatpush1.bf16.msra.mxu0 %v1103_v26 }
  0x92   :  { %667 = vmatprep.subr.bf16.mxu0 %v1108_v27 }
  0x95   :  { %668 = vmatpush1.bf16.msra.mxu0 %v1106_v28 }
 0x126   :  { %v162_v11 = vpop.f32.mrb[0].mxu0 }
 0x127   :  { %v163_v12 = vadd.f32 %v162_v11, %v90_v9  ;;  %v164_v13 = vpop.f32.mrb[1].mxu0 }
 0x128   :  { %v165_v14 = vadd.f32 %v164_v13, %v94_v10  ;;  %v166_v15 = vpop.f32.mrb[2].mxu0 }
 0x129   :  { %v167_v16 = vadd.f32 %v166_v15, %v90_v9  ;;  %v168_v17 = vpop.f32.mrb[3].mxu0  ;;  %v171_v19 = vmax.f32 %v163_v12, 0.0 }
 0x12a   :  { %v169_v18 = vadd.f32 %v168_v17, %v94_v10  ;;  %v172_v21 = vmax.f32 %v165_v14, 0.0 }
 0x12b   :  { %v173_v20 = vmax.f32 %v167_v16, 0.0 }
 0x12c   :  { %v174_v22 = vmax.f32 %v169_v18, 0.0 }
 0x12d   :  { %v175_v23 = vpack.c.bf16 %v173_v20, %v171_v19 }
 0x12e   :  { %v176_v24 = vpack.c.bf16 %v174_v22, %v172_v21 }
 0x130   :  { %414 = vmatprep.mubr.bf16.mxu1 %v176_v24 }
 0x131   :  { %415 = vmatmul.mubr.bf16.vlgmr.msra.gmra.mrb[0].mxu1 %v175_v23 }
 0x132   :  { %976 = vmatpush3.bf16.msra.mxu1 %v1110_v30 }
 0x133   :  { %977 = vmatprep.subr.bf16.mxu1 %v1111_v31 }
 0x136   :  { %978 = vmatpush3.bf16.msra.mxu1 %v1112_v32 }
 0x137   :  { %979 = vmatprep.subr.bf16.mxu1 %v1113_v33 }
 0x13a   :  { %980 = vmatpush3.bf16.msra.mxu1 %v1114_v34 }
 0x13b   :  { %981 = vmatprep.subr.bf16.mxu1 %v1115_v35 }
 0x13e   :  { %982 = vmatpush3.bf16.msra.mxu1 %v1116_v36 }
 0x13f   :  { %983 = vmatprep.subr.bf16.mxu1 %v1117_v37 }
 0x142   :  { %984 = vmatpush3.bf16.msra.mxu1 %v1118_v38 }
 0x143   :  { %985 = vmatprep.subr.bf16.mxu1 %v1119_v39 }
 0x146   :  { %986 = vmatpush3.bf16.msra.mxu1 %v1120_v57 }
 0x147   :  { %987 = vmatprep.subr.bf16.mxu1 %v1121_v58 }
 0x14a   :  { %988 = vmatpush3.bf16.msra.mxu1 %v1122_v59 }
 0x14b   :  { %989 = vmatprep.subr.bf16.mxu1 %v1123_v60 }
 0x14e   :  { %990 = vmatpush3.bf16.msra.mxu1 %v1124_v61 }
 0x204   :  { %v416_v43 = vpop.f32.mrb[0].mxu1 }
 0x205   :  { %v417_v44 = vadd.f32 %v416_v43, %v215_v41  ;;  %v418_v45 = vpop.f32.mrb[1].mxu1 }
 0x206   :  { %v419_v46 = vadd.f32 %v418_v45, %v219_v42  ;;  %v420_v47 = vpop.f32.mrb[2].mxu1 }
 0x207   :  { %v421_v48 = vadd.f32 %v420_v47, %v215_v41  ;;  %v422_v49 = vpop.f32.mrb[3].mxu1  ;;  %v425_v51 = vmax.f32 %v417_v44, 0.0 }
 0x208   :  { %v423_v50 = vadd.f32 %v422_v49, %v219_v42  ;;  %v426_v53 = vmax.f32 %v419_v46, 0.0 }
 0x209   :  { %v427_v52 = vmax.f32 %v421_v48, 0.0 }
 0x20a   :  { %v428_v54 = vmax.f32 %v423_v50, 0.0 }
 0x20b   :  { %v429_v55 = vpack.c.bf16 %v427_v52, %v425_v51 }
 0x20c   :  { %v430_v56 = vpack.c.bf16 %v428_v54, %v426_v53 }
 0x20e   :  { %669 = vmatprep.mubr.bf16.mxu0 %v430_v56 }
 0x20f   :  { %670 = vmatmul.mubr.bf16.vlgmr.msra.gmra.mrb[4].mxu0 %v429_v55 }
 0x2e2   :  { %v671_v1 = vpop.f32.mrb[4].mxu0 }
 0x2e3   :  { %v672_v2 = vadd.f32 %v671_v1, %v470_v63  ;;  %v673_v3 = vpop.f32.mrb[5].mxu0 }
 0x2e4   :  { %v674_v4 = vadd.f32 %v673_v3, %v474_v0  ;;  %v675_v5 = vpop.f32.mrb[6].mxu0 }
 0x2e5   :  { %v676_v7 = vadd.f32 %v675_v5, %v470_v63  ;;  %v677_v9 = vpop.f32.mrb[7].mxu0  ;;  %v680_v11 = vmax.f32 %v672_v2, 0.0 }
 0x2e6   :  { %v678_v10 = vadd.f32 %v677_v9, %v474_v0  ;;  %v681_v13 = vmax.f32 %v674_v4, 0.0 }
 0x2e7   :  { %v682_v12 = vmax.f32 %v676_v7, 0.0 }
 0x2e8   :  { %v683_v14 = vmax.f32 %v678_v10, 0.0 }
 0x2e9   :  { %v684_v15 = vpack.c.bf16 %v682_v12, %v680_v11 }
 0x2ea   :  { %v685_v16 = vpack.c.bf16 %v683_v14, %v681_v13 }
 0x2ec   :  { %853 = vmatprep.mubr.bf16.mxu1 %v685_v16 }
 0x2ed   :  { %854 = vmatmul.mubr.bf16.vlgmr.msra.gmra.mrb[4].mxu1 %v684_v15 }
 0x3c0   :  { %v991_v17 = vpop.f32.mrb[4].mxu1 }
 0x3c1   :  { %v992_v8 = vpop.f32.mrb[5].mxu1 }
 0x3c2   :  { %v993_v18 = vadd.f32 %v992_v8, %v991_v17  ;;  %v994_v19 = vpop.f32.mrb[6].mxu1 }
 0x3c3   :  { %v995_v20 = vpop.f32.mrb[7].mxu1 }
 0x3c4   :  { %v856_v21 = vadd.f32 %v993_v18, %v958_v6  ;;  %v996_v22 = vadd.f32 %v995_v20, %v994_v19 }
 0x3c6   :  { %1125 = vtanh.f32 %v856_v21  ;;  %v859_v23 = vadd.f32 %v996_v22, %v958_v6 }
 0x3c8   :  { %1127 = vtanh.f32 %v859_v23 }
 0x3d0   :  { %v1126_v24 = vpop.eup %1125 }
 0x3d1   :  { %864 = vst [vmem:[#allocation10] sm:$0xff] %v1126_v24 }
 0x3d2   :  { %v1128_v25 = vpop.eup %1127 }
 0x3d3   :  { %865 = vst [vmem:[#allocation10 + $0x8] sm:$0xff] %v1128_v25 }
 0x3d4   :  { %1228 = shalt.err (!%p1225_p8)
}
 0x3d5   :  { %s1229_s11 = scalar_lea.hbm %s1402_s6, 256 }
 0x3d6   :  { %p1230_p9 = scmp.ne.s32.totalorder %s1402_s6, %s1229_s11  ;;  %p1233_p10 = scmp.lt.u32.totalorder %s1229_s11, %s1402_s6 }
 0x3d8   :  { %p1235_p11 = pnand %p1233_p10, %p1230_p9 }
 0x3da   :  { %1238 = shalt.err (!%p1235_p11)
}
 0x3db   :  { %877 = dma.vmem_to_hbm [thread:$0]  %s872_s30, 256, %s1402_s6, [#allocation4], %s1248_s7, %s1248_s7, %s1249_s8  }
 0x3dc   :  { %1245 = dma.done.wait [#allocation4], 256  }
 0x3dd   :  { %1246 = vsyncadd [#allocation4], 4294967040 }
 0x3de   :  { %881 = vsyncpa [#allocation3], 1 }
 0x3df   :  { %882 = vsyncpa [#allocation6], 1 }
 0x3e0   :  { %883 = vsyncpa [#allocation9], 1 }
 0x3e1   :  { %884 = vsyncpa [#allocation4], 1 }

// kernel: tpu_custom_call.1
= control target key start
LH: loop header
LB: loop body
LE: loop exit
PB: predicated region body
PF: predicated region fallthrough
CT: control target
= control target key end

     0   :  { %11 = vsyncpa [#allocation3], 0  ;;  %s1396_s0 = inlined_call_operand.hbm [shape: bf16[16,24], index: 0, kind: input, shape index: {}]   ;;  %s1397_s1 = inlined_call_operand.hbm [shape: bf16[24,256], index: 1, kind: input, shape index: {}]   ;;  %s1398_s2 = inlined_call_operand.hbm [shape: bf16[2,256,256], index: 2, kind: input, shape index: {}]   ;;  %s1399_s3 = inlined_call_operand.vmem [shape: f32[3,256], index: 3, kind: input, shape index: {}]   ;;  %s1400_s4 = inlined_call_operand.hbm [shape: bf16[256,128], index: 4, kind: input, shape index: {}]   ;;  %s1401_s5 = inlined_call_operand.vmem [shape: f32[1,128], index: 5, kind: input, shape index: {}]   ;;  %s1402_s6 = inlined_call_operand.hbm [shape: f32[16,128], index: 6, kind: output, shape index: {}]  }
   0x1   :  { %12 = vsyncpa [#allocation6], 0 }
   0x2   :  { %13 = vsyncpa [#allocation9], 0 }
   0x3   :  { %14 = vsyncpa [#allocation4], 0  ;;  %s1247_s21 = smov [#allocation5]   ;;  %s1129_s25 = scalar_lea.hbm %s1397_s1, 384 }
   0x4   :  { %s32_s22 = sshll.u32 %s1247_s21, 4  ;;  %p1130_p0 = scmp.ne.s32.totalorder %s1397_s1, %s1129_s25  ;;  %s33_s22 = int_to_ptr.vmem [resolvable:$true] %s32_s22 }
   0x5   :  { %p1133_p1 = scmp.lt.u32.totalorder %s1129_s25, %s1397_s1 }
   0x7   :  { %p1135_p2 = pnand %p1133_p1, %p1130_p0 }
   0x9   :  { %1138 = shalt.err (!%p1135_p2)
}
   0xa   :  { %s1139_s30 = scalar_lea.vmem %s33_s22, 384  ;;  %p1144_p4 = scmp.lt.s32.totalorder %s33_s22, %s33_s22 }
   0xb   :  { %p1140_p3 = scmp.ne.s32.totalorder %s33_s22, %s1139_s30  ;;  %p1145_p5 = scmp.lt.s32.totalorder %s1139_s30, %s1139_s30 }
   0xd   :  { %p1146_p6 = por %p1145_p5, %p1144_p4 }
   0xf   :  { %p1147_p7 = pnand %p1146_p6, %p1140_p3 }
  0x11   :  { %1150 = shalt.err (!%p1147_p7)
}
  0x12   :  { %s1248_s7 = smov 128   ;;  %s1249_s8 = smov 8  }
  0x13   :  { %38 = dma.hbm_to_vmem [thread:$0]  %s1397_s1, 384, %s33_s22, [#allocation6], %s1248_s7, %s1248_s7, %s1249_s8  }
  0x14   :  { %s1250_s11 = smov [#allocation2]   ;;  %s1151_s15 = scalar_lea.hbm %s1396_s0, 128 }
  0x15   :  { %s20_s12 = sshll.u32 %s1250_s11, 4  ;;  %p1152_p8 = scmp.ne.s32.totalorder %s1396_s0, %s1151_s15  ;;  %s21_s12 = int_to_ptr.vmem [resolvable:$true] %s20_s12 }
  0x16   :  { %p1155_p9 = scmp.lt.u32.totalorder %s1151_s15, %s1396_s0 }
  0x18   :  { %p1157_p10 = pnand %p1155_p9, %p1152_p8 }
  0x1a   :  { %1160 = shalt.err (!%p1157_p10)
}
  0x1b   :  { %s1161_s20 = scalar_lea.vmem %s21_s12, 128  ;;  %p1166_p12 = scmp.lt.s32.totalorder %s21_s12, %s21_s12 }
  0x1c   :  { %p1162_p11 = scmp.ne.s32.totalorder %s21_s12, %s1161_s20  ;;  %p1167_p13 = scmp.lt.s32.totalorder %s1161_s20, %s1161_s20 }
  0x1e   :  { %p1168_p0 = por %p1167_p13, %p1166_p12 }
  0x20   :  { %p1169_p1 = pnand %p1168_p0, %p1162_p11 }
  0x22   :  { %1172 = shalt.err (!%p1169_p1)
}
  0x23   :  { %s1251_s1 = smov 64   ;;  %s1252_s21 = smov 4  }
  0x24   :  { %26 = dma.hbm_to_vmem [thread:$0]  %s1396_s0, 128, %s21_s12, [#allocation3], %s1251_s1, %s1251_s1, %s1252_s21  }
  0x25   :  { %s1253_s24 = smov [#allocation7]   ;;  %s1254_s26 = smov [#allocation8]  }
  0x26   :  { %s44_s25 = sshll.u32 %s1253_s24, 4  ;;  %s58_s27 = sshll.u32 %s1254_s26, 4  ;;  %s45_s25 = int_to_ptr.vmem [resolvable:$true] %s44_s25  ;;  %s1322_s27 = int_to_ptr.vmem [resolvable:$true] %s58_s27 }
  0x27   :  { %s1173_s30 = scalar_lea.hbm %s1398_s2, 8192 }
  0x28   :  { %p1174_p2 = scmp.ne.s32.totalorder %s1398_s2, %s1173_s30  ;;  %p1177_p3 = scmp.lt.u32.totalorder %s1173_s30, %s1398_s2 }
  0x2a   :  { %p1179_p4 = pnand %p1177_p3, %p1174_p2 }
  0x2c   :  { %1182 = shalt.err (!%p1179_p4)
}
  0x2d   :  { %s1183_s0 = scalar_lea.vmem %s45_s25, 8192  ;;  %p1188_p6 = scmp.lt.s32.totalorder %s45_s25, %s45_s25 }
  0x2e   :  { %p1184_p5 = scmp.ne.s32.totalorder %s45_s25, %s1183_s0  ;;  %p1189_p7 = scmp.lt.s32.totalorder %s1183_s0, %s1183_s0 }
  0x30   :  { %p1190_p8 = por %p1189_p7, %p1188_p6 }
  0x32   :  { %p1191_p9 = pnand %p1190_p8, %p1184_p5 }
  0x34   :  { %1194 = shalt.err (!%p1191_p9)
}
  0x35   :  { %50 = dma.hbm_to_vmem [thread:$0]  %s1398_s2, 8192, %s45_s25, [#allocation6], %s1248_s7, %s1248_s7, %s1249_s8  }
  0x36   :  { %s1195_s17 = scalar_lea.hbm %s1400_s4, 2048 }
  0x37   :  { %p1196_p10 = scmp.ne.s32.totalorder %s1400_s4, %s1195_s17  ;;  %p1199_p11 = scmp.lt.u32.totalorder %s1195_s17, %s1400_s4 }
  0x39   :  { %p1201_p12 = pnand %p1199_p11, %p1196_p10 }
  0x3b   :  { %1204 = shalt.err (!%p1201_p12)
}
  0x3c   :  { %s1205_s23 = scalar_lea.vmem %s1322_s27, 2048  ;;  %p1210_p0 = scmp.lt.s32.totalorder %s1322_s27, %s1322_s27 }
  0x3d   :  { %p1206_p13 = scmp.ne.s32.totalorder %s1322_s27, %s1205_s23  ;;  %p1211_p1 = scmp.lt.s32.totalorder %s1205_s23, %s1205_s23 }
  0x3f   :  { %p1212_p2 = por %p1211_p1, %p1210_p0 }
  0x41   :  { %p1213_p3 = pnand %p1212_p2, %p1206_p13 }
  0x43   :  { %1216 = shalt.err (!%p1213_p3)
}
  0x44   :  { %64 = dma.hbm_to_vmem [thread:$0]  %s1400_s4, 2048, %s1322_s27, [#allocation9], %s1251_s1, %s1251_s1, %s1252_s21  }
  0x45   :  { %1239 = dma.done.wait [#allocation3], 128  }
  0x46   :  { %1240 = vsyncadd [#allocation3], 4294967168 }
  0x47   :  { %1241 = dma.done.wait [#allocation6], 8576  }
  0x48   :  { %1242 = vsyncadd [#allocation6], 4294958720 }
  0x49   :  { %1243 = dma.done.wait [#allocation9], 2048  }
  0x4a   :  { %1244 = vsyncadd [#allocation9], 4294965248  ;;  %v1255_v0 = vmov 0   ;;  %v1007_v1 = vld [vmem:[#allocation5 + $0x4] ss:$8 sps:$4 sm:$0xff]   ;;  %v84_v3 = vld [vmem:[#allocation5 + $0x10] sm:$0xff] }
  0x4b   :  { %160 = vmatprep.mubr.bf16.mxu0 %v1255_v0  ;;  %v1009_v2 = vld [vmem:[#allocation5] ss:$8 sps:$4 sm:$0xff]   ;;  %vm121_vm0 = vcmask 1043456   ;;  %128 = vmatprep.subr.bf16.mxu0 %v1007_v1  ;;  %v889_v4 = vcombine.high %v84_v3, %v84_v3  ;;  %v888_v5 = vcombine.low %v84_v3, %v84_v3  ;;  %v1013_v6 = vld [vmem:[#allocation7 + $0x4] ss:$8 sps:$4 sm:$0xff]   ;;  %vm117_vm1 = vcmask 195584  }
  0x4c   :  { %129 = vmatpush1.bf16.msra.mxu0 %v1009_v2  ;;  %v1015_v7 = vld [vmem:[#allocation7] ss:$8 sps:$4 sm:$0xff]   ;;  %v1016_v9 = vld [vmem:[#allocation7 + $0x14] ss:$8 sps:$4 sm:$0xff]   ;;  %382 = vmatprep.subr.bf16.mxu1 %v1013_v6  ;;  %v1018_v11 = vld [vmem:[#allocation7 + $0x10] ss:$8 sps:$4 sm:$0xff]  }
  0x4d   :  { %890 = vmatprep.subr.msk.bf16.mxu0 %vm121_vm0, %v889_v4  ;;  %v123_v8 = vsel %vm121_vm0, %v888_v5, 0  ;;  %v1012_v10 = vld [vmem:[#allocation2] sm:$0xff]   ;;  %383 = vmatpush1.bf16.msra.mxu1 %v1015_v7  ;;  %v1022_v14 = vld [vmem:[#allocation7 + $0x34] ss:$8 sps:$4 sm:$0xff]   ;;  %v1024_v15 = vld [vmem:[#allocation7 + $0x30] ss:$8 sps:$4 sm:$0xff]   ;;  %v87_v4 = vlaneseq }
  0x4e   :  { %384 = vmatprep.subr.bf16.mxu1 %v1016_v9  ;;  %v1019_v12 = vld [vmem:[#allocation7 + $0x24] ss:$8 sps:$4 sm:$0xff]   ;;  %v1021_v13 = vld [vmem:[#allocation7 + $0x20] ss:$8 sps:$4 sm:$0xff]   ;;  %v1028_v18 = vld [vmem:[#allocation7 + $0x54] ss:$8 sps:$4 sm:$0xff]  }
  0x4f   :  { %v1025_v16 = vld [vmem:[#allocation7 + $0x44] ss:$8 sps:$4 sm:$0xff]   ;;  %v1027_v17 = vld [vmem:[#allocation7 + $0x40] ss:$8 sps:$4 sm:$0xff]   ;;  %v1030_v19 = vld [vmem:[#allocation7 + $0x50] ss:$8 sps:$4 sm:$0xff]  }
  0x50   :  { %131 = vmatpush1.bf16.msra.mxu0 %v123_v8  ;;  %v1031_v20 = vld [vmem:[#allocation7 + $0x64] ss:$8 sps:$4 sm:$0xff]   ;;  %v1033_v21 = vld [vmem:[#allocation7 + $0x60] ss:$8 sps:$4 sm:$0xff]   ;;  %v1034_v22 = vld [vmem:[#allocation7 + $0x74] ss:$8 sps:$4 sm:$0xff]  }
  0x51   :  { %385 = vmatpush1.bf16.msra.mxu1 %v1018_v11  ;;  %v1036_v23 = vld [vmem:[#allocation7 + $0x70] ss:$8 sps:$4 sm:$0xff]   ;;  %v1037_v24 = vld [vmem:[#allocation7 + $0x84] ss:$8 sps:$4 sm:$0xff]   ;;  %v1039_v25 = vld [vmem:[#allocation7 + $0x80] ss:$8 sps:$4 sm:$0xff]  }
  0x52   :  { %386 = vmatprep.subr.bf16.mxu1 %v1019_v12  ;;  %v1040_v26 = vld [vmem:[#allocation7 + $0x94] ss:$8 sps:$4 sm:$0xff]   ;;  %v1042_v27 = vld [vmem:[#allocation7 + $0x90] ss:$8 sps:$4 sm:$0xff]   ;;  %v1043_v28 = vld [vmem:[#allocation7 + $0xa4] ss:$8 sps:$4 sm:$0xff]  }
  0x53   :  { %891 = vmatmul.mubr.msk.bf16.vlgmr.msra.gmra.mrb[0].mxu0 %vm117_vm1, %v1012_v10  ;;  %v1045_v29 = vld [vmem:[#allocation7 + $0xa0] ss:$8 sps:$4 sm:$0xff]   ;;  %v1046_v30 = vld [vmem:[#allocation7 + $0xb4] ss:$8 sps:$4 sm:$0xff]   ;;  %v1048_v31 = vld [vmem:[#allocation7 + $0xb0] ss:$8 sps:$4 sm:$0xff]  }
  0x54   :  { %v1049_v32 = vld [vmem:[#allocation7 + $0xc4] ss:$8 sps:$4 sm:$0xff]   ;;  %v1051_v33 = vld [vmem:[#allocation7 + $0xc0] ss:$8 sps:$4 sm:$0xff]   ;;  %v1052_v34 = vld [vmem:[#allocation7 + $0xd4] ss:$8 sps:$4 sm:$0xff]  }
  0x55   :  { %387 = vmatpush1.bf16.msra.mxu1 %v1021_v13  ;;  %v1054_v35 = vld [vmem:[#allocation7 + $0xd0] ss:$8 sps:$4 sm:$0xff]   ;;  %v1055_v36 = vld [vmem:[#allocation7 + $0xe4] ss:$8 sps:$4 sm:$0xff]   ;;  %v1057_v37 = vld [vmem:[#allocation7 + $0xe0] ss:$8 sps:$4 sm:$0xff]  }
  0x56   :  { %388 = vmatprep.subr.bf16.mxu1 %v1022_v14  ;;  %v1058_v38 = vld [vmem:[#allocation7 + $0xf4] ss:$8 sps:$4 sm:$0xff]   ;;  %v1060_v39 = vld [vmem:[#allocation7 + $0xf0] ss:$8 sps:$4 sm:$0xff]   ;;  %v1061_v40 = vld [vmem:[#allocation7 + $0x100] ss:$8 sps:$4 sm:$0xff]  }
  0x57   :  { %v1063_v41 = vld [vmem:[#allocation7 + $0x104] ss:$8 sps:$4 sm:$0xff]   ;;  %v1066_v42 = vld [vmem:[#allocation7 + $0x114] ss:$8 sps:$4 sm:$0xff]   ;;  %v1064_v43 = vld [vmem:[#allocation7 + $0x110] ss:$8 sps:$4 sm:$0xff]  }
  0x58   :  { %637 = vmatprep.subr.bf16.mxu0 %v1063_v41  ;;  %v1069_v44 = vld [vmem:[#allocation7 + $0x124] ss:$8 sps:$4 sm:$0xff]   ;;  %v1067_v45 = vld [vmem:[#allocation7 + $0x120] ss:$8 sps:$4 sm:$0xff]   ;;  %v1072_v46 = vld [vmem:[#allocation7 + $0x134] ss:$8 sps:$4 sm:$0xff]  }
  0x59   :  { %389 = vmatpush1.bf16.msra.mxu1 %v1024_v15  ;;  %638 = vmatpush1.bf16.msra.mxu0 %v1061_v40  ;;  %v1070_v47 = vld [vmem:[#allocation7 + $0x130] ss:$8 sps:$4 sm:$0xff]   ;;  %v1075_v48 = vld [vmem:[#allocation7 + $0x144] ss:$8 sps:$4 sm:$0xff]   ;;  %v1073_v49 = vld [vmem:[#allocation7 + $0x140] ss:$8 sps:$4 sm:$0xff]  }
  0x5a   :  { %390 = vmatprep.subr.bf16.mxu1 %v1025_v16  ;;  %639 = vmatprep.subr.bf16.mxu0 %v1066_v42  ;;  %v1078_v50 = vld [vmem:[#allocation7 + $0x154] ss:$8 sps:$4 sm:$0xff]   ;;  %v1076_v51 = vld [vmem:[#allocation7 + $0x150] ss:$8 sps:$4 sm:$0xff]   ;;  %v1081_v52 = vld [vmem:[#allocation7 + $0x164] ss:$8 sps:$4 sm:$0xff]  }
  0x5b   :  { %v1079_v53 = vld [vmem:[#allocation7 + $0x160] ss:$8 sps:$4 sm:$0xff]   ;;  %v1084_v54 = vld [vmem:[#allocation7 + $0x174] ss:$8 sps:$4 sm:$0xff]   ;;  %v1082_v55 = vld [vmem:[#allocation7 + $0x170] ss:$8 sps:$4 sm:$0xff]  }
  0x5c   :  { %v1087_v56 = vld [vmem:[#allocation7 + $0x184] ss:$8 sps:$4 sm:$0xff]   ;;  %v1085_v57 = vld [vmem:[#allocation7 + $0x180] ss:$8 sps:$4 sm:$0xff]   ;;  %v1090_v58 = vld [vmem:[#allocation7 + $0x194] ss:$8 sps:$4 sm:$0xff]  }
  0x5d   :  { %391 = vmatpush1.bf16.msra.mxu1 %v1027_v17  ;;  %640 = vmatpush1.bf16.msra.mxu0 %v1064_v43  ;;  %v1088_v59 = vld [vmem:[#allocation7 + $0x190] ss:$8 sps:$4 sm:$0xff]   ;;  %v1093_v60 = vld [vmem:[#allocation7 + $0x1a4] ss:$8 sps:$4 sm:$0xff]   ;;  %v1091_v61 = vld [vmem:[#allocation7 + $0x1a0] ss:$8 sps:$4 sm:$0xff]  }
  0x5e   :  { %392 = vmatprep.subr.bf16.mxu1 %v1028_v18  ;;  %641 = vmatprep.subr.bf16.mxu0 %v1069_v44  ;;  %v1096_v62 = vld [vmem:[#allocation7 + $0x1b4] ss:$8 sps:$4 sm:$0xff]   ;;  %v1094_v63 = vld [vmem:[#allocation7 + $0x1b0] ss:$8 sps:$4 sm:$0xff]   ;;  %v1099_v0 = vld [vmem:[#allocation7 + $0x1c4] ss:$8 sps:$4 sm:$0xff]  }
  0x5f   :  { %v1097_v1 = vld [vmem:[#allocation7 + $0x1c0] ss:$8 sps:$4 sm:$0xff]   ;;  %v1102_v2 = vld [vmem:[#allocation7 + $0x1d4] ss:$8 sps:$4 sm:$0xff]   ;;  %v1100_v3 = vld [vmem:[#allocation7 + $0x1d0] ss:$8 sps:$4 sm:$0xff]  }
  0x60   :  { %v88_v5 = vshrl.u32 %v87_v4, 7  ;;  %v85_v7 = vld [vmem:[%s1399_s3] ss:$4 sm:$0x3]  ;;  %s1256_s29 = smov [#allocation10]  }
  0x61   :  { %393 = vmatpush1.bf16.msra.mxu1 %v1030_v19  ;;  %642 = vmatpush1.bf16.msra.mxu0 %v1067_v45  ;;  %v892_v40 = vld [vmem:[%s1399_s3 + $0x1] ss:$4 sm:$0x3]  ;;  %s871_s30 = sshll.u32 %s1256_s29, 4  ;;  %s872_s30 = int_to_ptr.vmem [resolvable:$true] %s871_s30 }
  0x62   :  { %394 = vmatprep.subr.bf16.mxu1 %v1031_v20  ;;  %643 = vmatprep.subr.bf16.mxu0 %v1072_v46  ;;  %v1359_v6 = vsub.s32 0, %v88_v5  ;;  %v1364_v8 = vsub.s32 1, %v88_v5  ;;  %s1217_s9 = scalar_lea.vmem %s872_s30, 256  ;;  %p1222_p5 = scmp.lt.s32.totalorder %s872_s30, %s872_s30 }
  0x63   :  { %p1218_p4 = scmp.ne.s32.totalorder %s872_s30, %s1217_s9  ;;  %p1223_p6 = scmp.lt.s32.totalorder %s1217_s9, %s1217_s9 }
  0x64   :  { %v90_v9 = vrot.slane %v85_v7, %v1359_v6  ;;  %v94_v10 = vrot.slane %v85_v7, %v1364_v8  ;;  %v215_v41 = vrot.slane %v892_v40, %v1359_v6  ;;  %v219_v42 = vrot.slane %v892_v40, %v1364_v8 }
  0x65   :  { %395 = vmatpush1.bf16.msra.mxu1 %v1033_v21  ;;  %644 = vmatpush1.bf16.msra.mxu0 %v1070_v47  ;;  %p1224_p7 = por %p1223_p6, %p1222_p5 }
  0x66   :  { %396 = vmatprep.subr.bf16.mxu1 %v1034_v22  ;;  %645 = vmatprep.subr.bf16.mxu0 %v1075_v48 }
  0x67   :  { %p1225_p8 = pnand %p1224_p7, %p1218_p4 }
  0x69   :  { %397 = vmatpush1.bf16.msra.mxu1 %v1036_v23  ;;  %646 = vmatpush1.bf16.msra.mxu0 %v1073_v49 }
  0x6a   :  { %398 = vmatprep.subr.bf16.mxu1 %v1037_v24  ;;  %647 = vmatprep.subr.bf16.mxu0 %v1078_v50 }
  0x6d   :  { %399 = vmatpush1.bf16.msra.mxu1 %v1039_v25  ;;  %648 = vmatpush1.bf16.msra.mxu0 %v1076_v51  ;;  %v1105_v25 = vld [vmem:[#allocation7 + $0x1e4] ss:$8 sps:$4 sm:$0xff]  }
  0x6e   :  { %400 = vmatprep.subr.bf16.mxu1 %v1040_v26  ;;  %649 = vmatprep.subr.bf16.mxu0 %v1081_v52  ;;  %v1103_v26 = vld [vmem:[#allocation7 + $0x1e0] ss:$8 sps:$4 sm:$0xff]  }
  0x71   :  { %401 = vmatpush1.bf16.msra.mxu1 %v1042_v27  ;;  %650 = vmatpush1.bf16.msra.mxu0 %v1079_v53  ;;  %v1108_v27 = vld [vmem:[#allocation7 + $0x1f4] ss:$8 sps:$4 sm:$0xff]  }
  0x72   :  { %402 = vmatprep.subr.bf16.mxu1 %v1043_v28  ;;  %651 = vmatprep.subr.bf16.mxu0 %v1084_v54  ;;  %v1106_v28 = vld [vmem:[#allocation7 + $0x1f0] ss:$8 sps:$4 sm:$0xff]  }
  0x75   :  { %403 = vmatpush1.bf16.msra.mxu1 %v1045_v29  ;;  %652 = vmatpush1.bf16.msra.mxu0 %v1082_v55  ;;  %v1109_v29 = vld [vmem:[#allocation8 + $0x40] sm:$0xff]  }
  0x76   :  { %404 = vmatprep.subr.bf16.mxu1 %v1046_v30  ;;  %653 = vmatprep.subr.bf16.mxu0 %v1087_v56  ;;  %v1110_v30 = vld [vmem:[#allocation8] sm:$0xff]  }
  0x79   :  { %405 = vmatpush1.bf16.msra.mxu1 %v1048_v31  ;;  %654 = vmatpush1.bf16.msra.mxu0 %v1085_v57  ;;  %v1111_v31 = vld [vmem:[#allocation8 + $0x48] sm:$0xff]  }
  0x7a   :  { %406 = vmatprep.subr.bf16.mxu1 %v1049_v32  ;;  %655 = vmatprep.subr.bf16.mxu0 %v1090_v58  ;;  %v1112_v32 = vld [vmem:[#allocation8 + $0x8] sm:$0xff]   ;;  %v1121_v58 = vld [vmem:[#allocation8 + $0x70] sm:$0xff]  }
  0x7b   :  { %v1120_v57 = vld [vmem:[#allocation8 + $0x28] sm:$0xff]  }
  0x7d   :  { %407 = vmatpush1.bf16.msra.mxu1 %v1051_v33  ;;  %656 = vmatpush1.bf16.msra.mxu0 %v1088_v59  ;;  %v1113_v33 = vld [vmem:[#allocation8 + $0x50] sm:$0xff]  }
  0x7e   :  { %408 = vmatprep.subr.bf16.mxu1 %v1052_v34  ;;  %657 = vmatprep.subr.bf16.mxu0 %v1093_v60  ;;  %v1114_v34 = vld [vmem:[#allocation8 + $0x10] sm:$0xff]   ;;  %v1123_v60 = vld [vmem:[#allocation8 + $0x78] sm:$0xff]  }
  0x7f   :  { %v1122_v59 = vld [vmem:[#allocation8 + $0x30] sm:$0xff]  }
  0x81   :  { %409 = vmatpush1.bf16.msra.mxu1 %v1054_v35  ;;  %658 = vmatpush1.bf16.msra.mxu0 %v1091_v61  ;;  %v1115_v35 = vld [vmem:[#allocation8 + $0x58] sm:$0xff]  }
  0x82   :  { %410 = vmatprep.subr.bf16.mxu1 %v1055_v36  ;;  %659 = vmatprep.subr.bf16.mxu0 %v1096_v62  ;;  %v1116_v36 = vld [vmem:[#allocation8 + $0x18] sm:$0xff]   ;;  %v925_v62 = vld [vmem:[%s1399_s3 + $0x2] ss:$4 sm:$0x3] }
  0x83   :  { %v1124_v61 = vld [vmem:[#allocation8 + $0x38] sm:$0xff]  }
  0x85   :  { %411 = vmatpush1.bf16.msra.mxu1 %v1057_v37  ;;  %660 = vmatpush1.bf16.msra.mxu0 %v1094_v63  ;;  %v1117_v37 = vld [vmem:[#allocation8 + $0x60] sm:$0xff]   ;;  %v470_v63 = vrot.slane %v925_v62, %v1359_v6 }
  0x86   :  { %412 = vmatprep.subr.bf16.mxu1 %v1058_v38  ;;  %661 = vmatprep.subr.bf16.mxu0 %v1099_v0  ;;  %v1118_v38 = vld [vmem:[#allocation8 + $0x20] sm:$0xff]   ;;  %v474_v0 = vrot.slane %v925_v62, %v1364_v8 }
  0x87   :  { %v958_v6 = vld [vmem:[%s1401_s5] ss:$0 sm:$0xff] }
  0x89   :  { %413 = vmatpush1.bf16.msra.mxu1 %v1060_v39  ;;  %662 = vmatpush1.bf16.msra.mxu0 %v1097_v1  ;;  %v1119_v39 = vld [vmem:[#allocation8 + $0x68] sm:$0xff]  }
  0x8a   :  { %663 = vmatprep.subr.bf16.mxu0 %v1102_v2  ;;  %975 = vmatprep.subr.bf16.mxu1 %v1109_v29 }
  0x8d   :  { %664 = vmatpush1.bf16.msra.mxu0 %v1100_v3 }
  0x8e   :  { %665 = vmatprep.subr.bf16.mxu0 %v1105_v25 }
  0x91   :  { %666 = vmatpush1.bf16.msra.mxu0 %v1103_v26 }
  0x92   :  { %667 = vmatprep.subr.bf16.mxu0 %v1108_v27 }
  0x95   :  { %668 = vmatpush1.bf16.msra.mxu0 %v1106_v28 }
 0x126   :  { %v162_v11 = vpop.f32.mrb[0].mxu0 }
 0x127   :  { %v163_v12 = vadd.f32 %v162_v11, %v90_v9  ;;  %v164_v13 = vpop.f32.mrb[1].mxu0 }
 0x128   :  { %v165_v14 = vadd.f32 %v164_v13, %v94_v10  ;;  %v166_v15 = vpop.f32.mrb[2].mxu0 }
 0x129   :  { %v167_v16 = vadd.f32 %v166_v15, %v90_v9  ;;  %v168_v17 = vpop.f32.mrb[3].mxu0  ;;  %v171_v19 = vmax.f32 %v163_v12, 0.0 }
 0x12a   :  { %v169_v18 = vadd.f32 %v168_v17, %v94_v10  ;;  %v172_v21 = vmax.f32 %v165_v14, 0.0 }
 0x12b   :  { %v173_v20 = vmax.f32 %v167_v16, 0.0 }
 0x12c   :  { %v174_v22 = vmax.f32 %v169_v18, 0.0 }
 0x12d   :  { %v175_v23 = vpack.c.bf16 %v173_v20, %v171_v19 }
 0x12e   :  { %v176_v24 = vpack.c.bf16 %v174_v22, %v172_v21 }
 0x130   :  { %414 = vmatprep.mubr.bf16.mxu1 %v176_v24 }
 0x131   :  { %415 = vmatmul.mubr.bf16.vlgmr.msra.gmra.mrb[0].mxu1 %v175_v23 }
 0x132   :  { %976 = vmatpush3.bf16.msra.mxu1 %v1110_v30 }
 0x133   :  { %977 = vmatprep.subr.bf16.mxu1 %v1111_v31 }
 0x136   :  { %978 = vmatpush3.bf16.msra.mxu1 %v1112_v32 }
 0x137   :  { %979 = vmatprep.subr.bf16.mxu1 %v1113_v33 }
 0x13a   :  { %980 = vmatpush3.bf16.msra.mxu1 %v1114_v34 }
 0x13b   :  { %981 = vmatprep.subr.bf16.mxu1 %v1115_v35 }
 0x13e   :  { %982 = vmatpush3.bf16.msra.mxu1 %v1116_v36 }
 0x13f   :  { %983 = vmatprep.subr.bf16.mxu1 %v1117_v37 }
 0x142   :  { %984 = vmatpush3.bf16.msra.mxu1 %v1118_v38 }
 0x143   :  { %985 = vmatprep.subr.bf16.mxu1 %v1119_v39 }
 0x146   :  { %986 = vmatpush3.bf16.msra.mxu1 %v1120_v57 }
 0x147   :  { %987 = vmatprep.subr.bf16.mxu1 %v1121_v58 }
 0x14a   :  { %988 = vmatpush3.bf16.msra.mxu1 %v1122_v59 }
 0x14b   :  { %989 = vmatprep.subr.bf16.mxu1 %v1123_v60 }
 0x14e   :  { %990 = vmatpush3.bf16.msra.mxu1 %v1124_v61 }
 0x204   :  { %v416_v43 = vpop.f32.mrb[0].mxu1 }
 0x205   :  { %v417_v44 = vadd.f32 %v416_v43, %v215_v41  ;;  %v418_v45 = vpop.f32.mrb[1].mxu1 }
 0x206   :  { %v419_v46 = vadd.f32 %v418_v45, %v219_v42  ;;  %v420_v47 = vpop.f32.mrb[2].mxu1 }
 0x207   :  { %v421_v48 = vadd.f32 %v420_v47, %v215_v41  ;;  %v422_v49 = vpop.f32.mrb[3].mxu1  ;;  %v425_v51 = vmax.f32 %v417_v44, 0.0 }
 0x208   :  { %v423_v50 = vadd.f32 %v422_v49, %v219_v42  ;;  %v426_v53 = vmax.f32 %v419_v46, 0.0 }
 0x209   :  { %v427_v52 = vmax.f32 %v421_v48, 0.0 }
 0x20a   :  { %v428_v54 = vmax.f32 %v423_v50, 0.0 }
 0x20b   :  { %v429_v55 = vpack.c.bf16 %v427_v52, %v425_v51 }
 0x20c   :  { %v430_v56 = vpack.c.bf16 %v428_v54, %v426_v53 }
 0x20e   :  { %669 = vmatprep.mubr.bf16.mxu0 %v430_v56 }
 0x20f   :  { %670 = vmatmul.mubr.bf16.vlgmr.msra.gmra.mrb[4].mxu0 %v429_v55 }
 0x2e2   :  { %v671_v1 = vpop.f32.mrb[4].mxu0 }
 0x2e3   :  { %v672_v2 = vadd.f32 %v671_v1, %v470_v63  ;;  %v673_v3 = vpop.f32.mrb[5].mxu0 }
 0x2e4   :  { %v674_v4 = vadd.f32 %v673_v3, %v474_v0  ;;  %v675_v5 = vpop.f32.mrb[6].mxu0 }
 0x2e5   :  { %v676_v7 = vadd.f32 %v675_v5, %v470_v63  ;;  %v677_v9 = vpop.f32.mrb[7].mxu0  ;;  %v680_v11 = vmax.f32 %v672_v2, 0.0 }
 0x2e6   :  { %v678_v10 = vadd.f32 %v677_v9, %v474_v0  ;;  %v681_v13 = vmax.f32 %v674_v4, 0.0 }
 0x2e7   :  { %v682_v12 = vmax.f32 %v676_v7, 0.0 }
 0x2e8   :  { %v683_v14 = vmax.f32 %v678_v10, 0.0 }
 0x2e9   :  { %v684_v15 = vpack.c.bf16 %v682_v12, %v680_v11 }
 0x2ea   :  { %v685_v16 = vpack.c.bf16 %v683_v14, %v681_v13 }
 0x2ec   :  { %853 = vmatprep.mubr.bf16.mxu1 %v685_v16 }
 0x2ed   :  { %854 = vmatmul.mubr.bf16.vlgmr.msra.gmra.mrb[4].mxu1 %v684_v15 }
 0x3c0   :  { %v991_v17 = vpop.f32.mrb[4].mxu1 }
 0x3c1   :  { %v992_v8 = vpop.f32.mrb[5].mxu1 }
 0x3c2   :  { %v993_v18 = vadd.f32 %v992_v8, %v991_v17  ;;  %v994_v19 = vpop.f32.mrb[6].mxu1 }
 0x3c3   :  { %v995_v20 = vpop.f32.mrb[7].mxu1 }
 0x3c4   :  { %v856_v21 = vadd.f32 %v993_v18, %v958_v6  ;;  %v996_v22 = vadd.f32 %v995_v20, %v994_v19 }
 0x3c6   :  { %1125 = vtanh.f32 %v856_v21  ;;  %v859_v23 = vadd.f32 %v996_v22, %v958_v6 }
 0x3c8   :  { %1127 = vtanh.f32 %v859_v23 }
 0x3d0   :  { %v1126_v24 = vpop.eup %1125 }
 0x3d1   :  { %864 = vst [vmem:[#allocation10] sm:$0xff] %v1126_v24 }
 0x3d2   :  { %v1128_v25 = vpop.eup %1127 }
 0x3d3   :  { %865 = vst [vmem:[#allocation10 + $0x8] sm:$0xff] %v1128_v25 }
 0x3d4   :  { %1228 = shalt.err (!%p1225_p8)
}
 0x3d5   :  { %s1229_s11 = scalar_lea.hbm %s1402_s6, 256 }
 0x3d6   :  { %p1230_p9 = scmp.ne.s32.totalorder %s1402_s6, %s1229_s11  ;;  %p1233_p10 = scmp.lt.u32.totalorder %s1229_s11, %s1402_s6 }
 0x3d8   :  { %p1235_p11 = pnand %p1233_p10, %p1230_p9 }
 0x3da   :  { %1238 = shalt.err (!%p1235_p11)
}
 0x3db   :  { %877 = dma.vmem_to_hbm [thread:$0]  %s872_s30, 256, %s1402_s6, [#allocation4], %s1248_s7, %s1248_s7, %s1249_s8  }
 0x3dc   :  { %1245 = dma.done.wait [#allocation4], 256  }
 0x3dd   :  { %1246 = vsyncadd [#allocation4], 4294967040 }
 0x3de   :  { %881 = vsyncpa [#allocation3], 1 }
 0x3df   :  { %882 = vsyncpa [#allocation6], 1 }
 0x3e0   :  { %883 = vsyncpa [#allocation9], 1 }
 0x3e1   :  { %884 = vsyncpa [#allocation4], 1 }

</bundles_post_ra>
